<compile_context>
chip_gen: v7x
topology: tpu7x:2x2x1
jax: 0.10.0
libtpu: 0.0.40
codegen_flags: <defaults>
</compile_context>

<pallas_src>
import functools

import jax
import jax.numpy as jnp
from jax.experimental import pallas as pl
from jax.experimental.pallas import tpu as pltpu

HIDDEN = 32
NUM_HEADS = 4
HEAD_DIM = HIDDEN // NUM_HEADS
NUM_LAYERS = 2
SEQ_LEN = 8
BATCH = 2


def _tsa_kernel(x_ref, w_ref, b_ref, out_ref, *,
                num_layers, num_heads, head_dim, batch, seq):
    """Fused multi-layer multi-head self-attention.

    x_ref:   (seq*batch, E)        activations, seq-major rows (row = l*N + n)
    w_ref:   (num_layers, E, 4E)   [Wq^T*scale | Wk^T | Wv^T | Wout^T]
    b_ref:   (num_layers, 1, 4E)   [bq*scale   | bk   | bv   | bout  ]
    out_ref: (seq*batch, E)
    """
    embed = num_heads * head_dim

    h = x_ref[...].astype(jnp.float32)                              # (LN, E)

    for layer in range(num_layers):                                 # static unroll
        w = w_ref[layer]                                            # (E, 4E)
        b = b_ref[layer]                                            # (1, 4E)

        # Fused QKV projection: one (LN, E) @ (E, 3E) MXU pass.
        # Q-scale is already folded into the packed weights/bias.
        qkv = jnp.dot(h, w[:, :3 * embed],
                      preferred_element_type=jnp.float32) + b[:, :3 * embed]
        q = qkv[:, :embed]
        k = qkv[:, embed:2 * embed]
        v = qkv[:, 2 * embed:]

        def to_heads(t):
            # (L*N, E) -> (N*H, L, D): one relayout per tensor per layer.
            t = t.reshape(seq, batch, num_heads, head_dim)
            t = jnp.transpose(t, (1, 2, 0, 3))
            return t.reshape(batch * num_heads, seq, head_dim)

        qh, kh, vh = to_heads(q), to_heads(k), to_heads(v)

        # Batched attention over the merged (N*H) axis.
        s = jnp.einsum('bld,bmd->blm', qh, kh,
                       preferred_element_type=jnp.float32)          # (NH, L, L)
        m = jnp.max(s, axis=-1, keepdims=True)
        p = jnp.exp(s - m)
        denom = jnp.sum(p, axis=-1, keepdims=True)
        r = pl.reciprocal(denom, approx=True)
        r = r * (2.0 - denom * r)          # one Newton step -> ~f32 accuracy
        p = p * r

        ctx = jnp.einsum('blm,bmd->bld', p, vh,
                         preferred_element_type=jnp.float32)        # (NH, L, D)
        ctx = ctx.reshape(batch, num_heads, seq, head_dim)
        ctx = jnp.transpose(ctx, (2, 0, 1, 3))                      # (L, N, H, D)
        ctx = ctx.reshape(seq * batch, embed)                       # (LN, E)

        # Out-projection.
        h = jnp.dot(ctx, w[:, 3 * embed:],
                    preferred_element_type=jnp.float32) + b[:, 3 * embed:]

    out_ref[...] = h.astype(out_ref.dtype)


def pack_params(params, num_heads=NUM_HEADS):
    """ONE-TIME packing (do NOT call per forward): pre-transpose, fold the
    1/sqrt(head_dim) scale into the Q projection, and concatenate each layer's
    weights/biases into a single 128-lane slab."""
    E = params[0][2].shape[0]
    head_dim = E // num_heads
    scale = head_dim ** -0.5
    w_slabs, b_slabs = [], []
    for in_w, in_b, out_w, out_b in params:
        w_q, w_kv = in_w[:E], in_w[E:]
        w_slab = jnp.concatenate([w_q.T * scale, w_kv.T, out_w.T], axis=1)   # (E, 4E)
        b_slab = jnp.concatenate([in_b[:E] * scale, in_b[E:], out_b])
        w_slabs.append(w_slab)
        b_slabs.append(b_slab.reshape(1, 4 * E))
    return jnp.stack(w_slabs), jnp.stack(b_slabs)


def tsa_layer_forward(x, packed, num_heads=NUM_HEADS):
    """x: (L, N, E) seq-first (PyTorch MHA default). `packed` from pack_params."""
    L, N, E = x.shape
    w_slab, b_slab = packed
    num_layers = w_slab.shape[0]

    # No per-call transposes: just view (L, N, E) as (L*N, E) rows.
    xb = x.reshape(L * N, E)

    kernel = functools.partial(
        _tsa_kernel, num_layers=num_layers, num_heads=num_heads,
        head_dim=E // num_heads, batch=N, seq=L)

    vmem = pl.BlockSpec(memory_space=pltpu.MemorySpace.VMEM)
    out = pl.pallas_call(
        kernel,
        out_shape=jax.ShapeDtypeStruct((L * N, E), x.dtype),
        in_specs=[vmem, vmem, vmem],
        out_specs=vmem,
    )(xb, w_slab, b_slab)

    return out.reshape(L, N, E)


# ---------------- pure-JAX reference (for correctness check) ----------------
def _mha_ref(x, layer_params):
    # x: (L, N, E)
    L, N, E = x.shape
    in_w, in_b, out_w, out_b = layer_params
    wq, wk, wv = in_w[:E], in_w[E:2 * E], in_w[2 * E:]
    bq, bk, bv = in_b[:E], in_b[E:2 * E], in_b[2 * E:]
    q = x @ wq.T + bq
    k = x @ wk.T + bk
    v = x @ wv.T + bv
    D = E // NUM_HEADS
    r = lambda t: jnp.transpose(t.reshape(L, N, NUM_HEADS, D), (1, 2, 0, 3))
    qh, kh, vh = r(q), r(k), r(v)
    s = jnp.einsum('nhld,nhmd->nhlm', qh * (D ** -0.5), kh)
    p = jax.nn.softmax(s, axis=-1)
    ctx = jnp.einsum('nhlm,nhmd->nhld', p, vh)                  # (N, H, L, D)
    ctx = jnp.transpose(ctx, (2, 0, 1, 3)).reshape(L, N, E)
    return ctx @ out_w.T + out_b


def tsa_ref(x, params):
    for lp in params:
        x = _mha_ref(x, lp)
    return x


def init_params(key, hidden, num_layers):
    params = []
    for _ in range(num_layers):
        k1, k2, k3, k4, key = jax.random.split(key, 5)
        lim = (6.0 / (hidden + hidden)) ** 0.5
        in_w = jax.random.uniform(k1, (3 * hidden, hidden), jnp.float32, -lim, lim)
        in_b = 0.01 * jax.random.normal(k2, (3 * hidden,), jnp.float32)
        out_w = jax.random.uniform(k3, (hidden, hidden), jnp.float32, -lim, lim)
        out_b = 0.01 * jax.random.normal(k4, (hidden,), jnp.float32)
        params.append((in_w, in_b, out_w, out_b))
    return params


if __name__ == "__main__":
    key = jax.random.PRNGKey(0)
    kx, kp = jax.random.split(key)
    # x: (L, N, E) = (seq, batch, hidden), seq-first as PyTorch MHA expects
    x = jax.random.normal(kx, (SEQ_LEN, BATCH, HIDDEN), jnp.float32)
    params = init_params(kp, HIDDEN, NUM_LAYERS)

    # One-time weight packing (outside the per-call forward path).
    packed = jax.block_until_ready(pack_params(params, NUM_HEADS))

    out = tsa_layer_forward(x, packed)
    out = jax.block_until_ready(out)

    ref = tsa_ref(x, params)
    assert out.shape == (SEQ_LEN, BATCH, HIDDEN)
    assert jnp.allclose(out, ref, atol=1e-4, rtol=1e-4), "mismatch vs reference"

    print("KERNEL_OK")
</pallas_src>

<mosaic_0001>
module attributes {stable_mosaic.version = 11 : i64} {
  func.func @_tsa_kernel(%arg0: memref<16x32xf32, #tpu.memory_space<vmem>>, %arg1: memref<2x32x128xf32, #tpu.memory_space<vmem>>, %arg2: memref<2x1x128xf32, #tpu.memory_space<vmem>>, %arg3: memref<16x32xf32, #tpu.memory_space<vmem>>) attributes {dimension_semantics = [], scalar_prefetch = 0 : i64, scratch_operands = 0 : i64, tpu.core_type = #tpu.core_type<tc>} {
    %c0 = arith.constant 0 : index
    %c0_0 = arith.constant 0 : index
    %0 = vector.load %arg0[%c0, %c0_0] : memref<16x32xf32, #tpu.memory_space<vmem>>, vector<16x32xf32>
    %c0_1 = arith.constant 0 : index
    %c0_2 = arith.constant 0 : index
    %c0_3 = arith.constant 0 : index
    %1 = vector.load %arg1[%c0_1, %c0_2, %c0_3] : memref<2x32x128xf32, #tpu.memory_space<vmem>>, vector<1x32x128xf32>
    %2 = vector.shape_cast %1 : vector<1x32x128xf32> to vector<32x128xf32>
    %c0_4 = arith.constant 0 : index
    %c0_5 = arith.constant 0 : index
    %c0_6 = arith.constant 0 : index
    %3 = vector.load %arg2[%c0_4, %c0_5, %c0_6] : memref<2x1x128xf32, #tpu.memory_space<vmem>>, vector<1x1x128xf32>
    %4 = vector.shape_cast %3 : vector<1x1x128xf32> to vector<1x128xf32>
    %5 = vector.extract_strided_slice %2 {offsets = [0, 0], sizes = [32, 96], strides = [1, 1]} : vector<32x128xf32> to vector<32x96xf32>
    %cst = arith.constant dense<0.000000e+00> : vector<16x96xf32>
    %6 = tpu.matmul %0, %5, %cst {dimension_numbers = #tpu.dot_dimension_numbers<[1], [0], [0], [1], [0, 0, 1, 1], [], []>} : vector<16x32xf32>, vector<32x96xf32>, vector<16x96xf32> -> vector<16x96xf32>
    %7 = vector.extract_strided_slice %4 {offsets = [0, 0], sizes = [1, 96], strides = [1, 1]} : vector<1x128xf32> to vector<1x96xf32>
    %8 = vector.broadcast %7 : vector<1x96xf32> to vector<16x96xf32>
    %9 = arith.addf %6, %8 : vector<16x96xf32>
    %10 = vector.extract_strided_slice %9 {offsets = [0, 0], sizes = [16, 32], strides = [1, 1]} : vector<16x96xf32> to vector<16x32xf32>
    %11 = vector.extract_strided_slice %9 {offsets = [0, 32], sizes = [16, 32], strides = [1, 1]} : vector<16x96xf32> to vector<16x32xf32>
    %12 = vector.extract_strided_slice %9 {offsets = [0, 64], sizes = [16, 32], strides = [1, 1]} : vector<16x96xf32> to vector<16x32xf32>
    %13 = vector.shape_cast %10 : vector<16x32xf32> to vector<8x2x4x8xf32>
    %14 = tpu.transpose %13, [1, 2, 0, 3] : vector<8x2x4x8xf32> -> vector<2x4x8x8xf32>
    %15 = vector.shape_cast %14 : vector<2x4x8x8xf32> to vector<8x8x8xf32>
    %16 = vector.shape_cast %11 : vector<16x32xf32> to vector<8x2x4x8xf32>
    %17 = tpu.transpose %16, [1, 2, 0, 3] : vector<8x2x4x8xf32> -> vector<2x4x8x8xf32>
    %18 = vector.shape_cast %17 : vector<2x4x8x8xf32> to vector<8x8x8xf32>
    %19 = vector.shape_cast %12 : vector<16x32xf32> to vector<8x2x4x8xf32>
    %20 = tpu.transpose %19, [1, 2, 0, 3] : vector<8x2x4x8xf32> -> vector<2x4x8x8xf32>
    %21 = vector.shape_cast %20 : vector<2x4x8x8xf32> to vector<8x8x8xf32>
    "tpu.trace_start"() <{level = 10 : i32, message = "bld,bmd->blm"}> : () -> ()
    %cst_7 = arith.constant dense<0.000000e+00> : vector<8x8x8xf32>
    %22 = tpu.matmul %15, %18, %cst_7 {dimension_numbers = #tpu.dot_dimension_numbers<[2], [2], [1], [1], [0, 0, 0, 1, 1, 1], [0], [0]>} : vector<8x8x8xf32>, vector<8x8x8xf32>, vector<8x8x8xf32> -> vector<8x8x8xf32>
    "tpu.trace_stop"() : () -> ()
    %cst_8 = arith.constant dense<0xFF800000> : vector<8x8xf32>
    %23 = vector.multi_reduction <maximumf>, %22, %cst_8 [2] : vector<8x8x8xf32> to vector<8x8xf32>
    %24 = vector.shape_cast %23 : vector<8x8xf32> to vector<8x8x1xf32>
    %25 = vector.broadcast %24 : vector<8x8x1xf32> to vector<8x8x8xf32>
    %26 = arith.subf %22, %25 : vector<8x8x8xf32>
    %27 = math.exp %26 : vector<8x8x8xf32>
    %cst_9 = arith.constant dense<0.000000e+00> : vector<8x8xf32>
    %28 = vector.multi_reduction <add>, %27, %cst_9 [2] : vector<8x8x8xf32> to vector<8x8xf32>
    %29 = vector.shape_cast %28 : vector<8x8xf32> to vector<8x8x1xf32>
    %30 = tpu.reciprocal %29 {approx = true} : vector<8x8x1xf32> -> vector<8x8x1xf32>
    %31 = arith.mulf %29, %30 : vector<8x8x1xf32>
    %cst_10 = arith.constant 2.000000e+00 : f32
    %32 = vector.broadcast %cst_10 : f32 to vector<8x8x1xf32>
    %33 = arith.subf %32, %31 : vector<8x8x1xf32>
    %34 = arith.mulf %30, %33 : vector<8x8x1xf32>
    %35 = vector.broadcast %34 : vector<8x8x1xf32> to vector<8x8x8xf32>
    %36 = arith.mulf %27, %35 : vector<8x8x8xf32>
    "tpu.trace_start"() <{level = 10 : i32, message = "blm,bmd->bld"}> : () -> ()
    %cst_11 = arith.constant dense<0.000000e+00> : vector<8x8x8xf32>
    %37 = tpu.matmul %36, %21, %cst_11 {dimension_numbers = #tpu.dot_dimension_numbers<[2], [1], [1], [2], [0, 0, 0, 1, 1, 2], [0], [0]>} : vector<8x8x8xf32>, vector<8x8x8xf32>, vector<8x8x8xf32> -> vector<8x8x8xf32>
    "tpu.trace_stop"() : () -> ()
    %38 = vector.shape_cast %37 : vector<8x8x8xf32> to vector<2x4x8x8xf32>
    %39 = tpu.transpose %38, [2, 0, 1, 3] : vector<2x4x8x8xf32> -> vector<8x2x4x8xf32>
    %40 = vector.shape_cast %39 : vector<8x2x4x8xf32> to vector<16x32xf32>
    %41 = vector.extract_strided_slice %2 {offsets = [0, 96], sizes = [32, 32], strides = [1, 1]} : vector<32x128xf32> to vector<32x32xf32>
    %cst_12 = arith.constant dense<0.000000e+00> : vector<16x32xf32>
    %42 = tpu.matmul %40, %41, %cst_12 {dimension_numbers = #tpu.dot_dimension_numbers<[1], [0], [0], [1], [0, 0, 1, 1], [], []>} : vector<16x32xf32>, vector<32x32xf32>, vector<16x32xf32> -> vector<16x32xf32>
    %43 = vector.extract_strided_slice %4 {offsets = [0, 96], sizes = [1, 32], strides = [1, 1]} : vector<1x128xf32> to vector<1x32xf32>
    %44 = vector.broadcast %43 : vector<1x32xf32> to vector<16x32xf32>
    %45 = arith.addf %42, %44 : vector<16x32xf32>
    %c1 = arith.constant 1 : index
    %c0_13 = arith.constant 0 : index
    %c0_14 = arith.constant 0 : index
    %46 = vector.load %arg1[%c1, %c0_13, %c0_14] : memref<2x32x128xf32, #tpu.memory_space<vmem>>, vector<1x32x128xf32>
    %47 = vector.shape_cast %46 : vector<1x32x128xf32> to vector<32x128xf32>
    %c1_15 = arith.constant 1 : index
    %c0_16 = arith.constant 0 : index
    %c0_17 = arith.constant 0 : index
    %48 = vector.load %arg2[%c1_15, %c0_16, %c0_17] : memref<2x1x128xf32, #tpu.memory_space<vmem>>, vector<1x1x128xf32>
    %49 = vector.shape_cast %48 : vector<1x1x128xf32> to vector<1x128xf32>
    %50 = vector.extract_strided_slice %47 {offsets = [0, 0], sizes = [32, 96], strides = [1, 1]} : vector<32x128xf32> to vector<32x96xf32>
    %cst_18 = arith.constant dense<0.000000e+00> : vector<16x96xf32>
    %51 = tpu.matmul %45, %50, %cst_18 {dimension_numbers = #tpu.dot_dimension_numbers<[1], [0], [0], [1], [0, 0, 1, 1], [], []>} : vector<16x32xf32>, vector<32x96xf32>, vector<16x96xf32> -> vector<16x96xf32>
    %52 = vector.extract_strided_slice %49 {offsets = [0, 0], sizes = [1, 96], strides = [1, 1]} : vector<1x128xf32> to vector<1x96xf32>
    %53 = vector.broadcast %52 : vector<1x96xf32> to vector<16x96xf32>
    %54 = arith.addf %51, %53 : vector<16x96xf32>
    %55 = vector.extract_strided_slice %54 {offsets = [0, 0], sizes = [16, 32], strides = [1, 1]} : vector<16x96xf32> to vector<16x32xf32>
    %56 = vector.extract_strided_slice %54 {offsets = [0, 32], sizes = [16, 32], strides = [1, 1]} : vector<16x96xf32> to vector<16x32xf32>
    %57 = vector.extract_strided_slice %54 {offsets = [0, 64], sizes = [16, 32], strides = [1, 1]} : vector<16x96xf32> to vector<16x32xf32>
    %58 = vector.shape_cast %55 : vector<16x32xf32> to vector<8x2x4x8xf32>
    %59 = tpu.transpose %58, [1, 2, 0, 3] : vector<8x2x4x8xf32> -> vector<2x4x8x8xf32>
    %60 = vector.shape_cast %59 : vector<2x4x8x8xf32> to vector<8x8x8xf32>
    %61 = vector.shape_cast %56 : vector<16x32xf32> to vector<8x2x4x8xf32>
    %62 = tpu.transpose %61, [1, 2, 0, 3] : vector<8x2x4x8xf32> -> vector<2x4x8x8xf32>
    %63 = vector.shape_cast %62 : vector<2x4x8x8xf32> to vector<8x8x8xf32>
    %64 = vector.shape_cast %57 : vector<16x32xf32> to vector<8x2x4x8xf32>
    %65 = tpu.transpose %64, [1, 2, 0, 3] : vector<8x2x4x8xf32> -> vector<2x4x8x8xf32>
    %66 = vector.shape_cast %65 : vector<2x4x8x8xf32> to vector<8x8x8xf32>
    "tpu.trace_start"() <{level = 10 : i32, message = "bld,bmd->blm"}> : () -> ()
    %cst_19 = arith.constant dense<0.000000e+00> : vector<8x8x8xf32>
    %67 = tpu.matmul %60, %63, %cst_19 {dimension_numbers = #tpu.dot_dimension_numbers<[2], [2], [1], [1], [0, 0, 0, 1, 1, 1], [0], [0]>} : vector<8x8x8xf32>, vector<8x8x8xf32>, vector<8x8x8xf32> -> vector<8x8x8xf32>
    "tpu.trace_stop"() : () -> ()
    %cst_20 = arith.constant dense<0xFF800000> : vector<8x8xf32>
    %68 = vector.multi_reduction <maximumf>, %67, %cst_20 [2] : vector<8x8x8xf32> to vector<8x8xf32>
    %69 = vector.shape_cast %68 : vector<8x8xf32> to vector<8x8x1xf32>
    %70 = vector.broadcast %69 : vector<8x8x1xf32> to vector<8x8x8xf32>
    %71 = arith.subf %67, %70 : vector<8x8x8xf32>
    %72 = math.exp %71 : vector<8x8x8xf32>
    %cst_21 = arith.constant dense<0.000000e+00> : vector<8x8xf32>
    %73 = vector.multi_reduction <add>, %72, %cst_21 [2] : vector<8x8x8xf32> to vector<8x8xf32>
    %74 = vector.shape_cast %73 : vector<8x8xf32> to vector<8x8x1xf32>
    %75 = tpu.reciprocal %74 {approx = true} : vector<8x8x1xf32> -> vector<8x8x1xf32>
    %76 = arith.mulf %74, %75 : vector<8x8x1xf32>
    %cst_22 = arith.constant 2.000000e+00 : f32
    %77 = vector.broadcast %cst_22 : f32 to vector<8x8x1xf32>
    %78 = arith.subf %77, %76 : vector<8x8x1xf32>
    %79 = arith.mulf %75, %78 : vector<8x8x1xf32>
    %80 = vector.broadcast %79 : vector<8x8x1xf32> to vector<8x8x8xf32>
    %81 = arith.mulf %72, %80 : vector<8x8x8xf32>
    "tpu.trace_start"() <{level = 10 : i32, message = "blm,bmd->bld"}> : () -> ()
    %cst_23 = arith.constant dense<0.000000e+00> : vector<8x8x8xf32>
    %82 = tpu.matmul %81, %66, %cst_23 {dimension_numbers = #tpu.dot_dimension_numbers<[2], [1], [1], [2], [0, 0, 0, 1, 1, 2], [0], [0]>} : vector<8x8x8xf32>, vector<8x8x8xf32>, vector<8x8x8xf32> -> vector<8x8x8xf32>
    "tpu.trace_stop"() : () -> ()
    %83 = vector.shape_cast %82 : vector<8x8x8xf32> to vector<2x4x8x8xf32>
    %84 = tpu.transpose %83, [2, 0, 1, 3] : vector<2x4x8x8xf32> -> vector<8x2x4x8xf32>
    %85 = vector.shape_cast %84 : vector<8x2x4x8xf32> to vector<16x32xf32>
    %86 = vector.extract_strided_slice %47 {offsets = [0, 96], sizes = [32, 32], strides = [1, 1]} : vector<32x128xf32> to vector<32x32xf32>
    %cst_24 = arith.constant dense<0.000000e+00> : vector<16x32xf32>
    %87 = tpu.matmul %85, %86, %cst_24 {dimension_numbers = #tpu.dot_dimension_numbers<[1], [0], [0], [1], [0, 0, 1, 1], [], []>} : vector<16x32xf32>, vector<32x32xf32>, vector<16x32xf32> -> vector<16x32xf32>
    %88 = vector.extract_strided_slice %49 {offsets = [0, 96], sizes = [1, 32], strides = [1, 1]} : vector<1x128xf32> to vector<1x32xf32>
    %89 = vector.broadcast %88 : vector<1x32xf32> to vector<16x32xf32>
    %90 = arith.addf %87, %89 : vector<16x32xf32>
    %c0_25 = arith.constant 0 : index
    %c0_26 = arith.constant 0 : index
    %91 = vector.load %arg3[%c0_25, %c0_26] : memref<16x32xf32, #tpu.memory_space<vmem>>, vector<16x32xf32>
    tpu.vector_store %arg3[%c0_25, %c0_26], %90 {strides = array<i32>} : memref<16x32xf32, #tpu.memory_space<vmem>>, vector<16x32xf32>,
    return
  }
}

</mosaic_0001>

<bundles_post_ra>
// kernel: tpu_custom_call.1
= control target key start
LH: loop header
LB: loop body
LE: loop exit
PB: predicated region body
PF: predicated region fallthrough
CT: control target
= control target key end

     0   :  { %8 = vsyncpa [#allocation3], 0  ;;  %s6991_s0 = inlined_call_operand.hbm [shape: f32[16,32], index: 0, kind: input, shape index: {}]   ;;  %s6992_s1 = inlined_call_operand.hbm [shape: f32[2,32,128], index: 1, kind: input, shape index: {}]   ;;  %s6993_s2 = inlined_call_operand.vmem [shape: f32[2,1,128], index: 2, kind: input, shape index: {}]   ;;  %s6994_s3 = inlined_call_operand.hbm [shape: f32[16,32], index: 3, kind: output, shape index: {}]  }
   0x1   :  { %9 = vsyncpa [#allocation6], 0 }
   0x2   :  { %10 = vsyncpa [#allocation4], 0  ;;  %s6019_s12 = smov [#allocation2]   ;;  %s5947_s16 = scalar_lea.hbm %s6991_s0, 256 }
   0x3   :  { %s16_s13 = sshll.u32 %s6019_s12, 4  ;;  %p5948_p0 = scmp.ne.s32.totalorder %s6991_s0, %s5947_s16  ;;  %s17_s13 = int_to_ptr.vmem [resolvable:$true] %s16_s13 }
   0x4   :  { %p5951_p1 = scmp.lt.u32.totalorder %s5947_s16, %s6991_s0 }
   0x6   :  { %p5953_p2 = pnand %p5951_p1, %p5948_p0 }
   0x8   :  { %5956 = shalt.err (!%p5953_p2)
}
   0x9   :  { %s5957_s21 = scalar_lea.vmem %s17_s13, 256  ;;  %p5962_p4 = scmp.lt.s32.totalorder %s17_s13, %s17_s13 }
   0xa   :  { %p5958_p3 = scmp.ne.s32.totalorder %s17_s13, %s5957_s21  ;;  %p5963_p5 = scmp.lt.s32.totalorder %s5957_s21, %s5957_s21 }
   0xc   :  { %p5964_p6 = por %p5963_p5, %p5962_p4 }
   0xe   :  { %p5965_p7 = pnand %p5964_p6, %p5958_p3 }
  0x10   :  { %5968 = shalt.err (!%p5965_p7)
}
  0x11   :  { %s6020_s22 = smov 128   ;;  %s6021_s23 = smov 8  }
  0x12   :  { %22 = dma.hbm_to_vmem [thread:$0]  %s6991_s0, 256, %s17_s13, [#allocation3], %s6020_s22, %s6020_s22, %s6021_s23  }
  0x13   :  { %s6022_s26 = smov [#allocation5]   ;;  %s5969_s30 = scalar_lea.hbm %s6992_s1, 1024 }
  0x14   :  { %s28_s27 = sshll.u32 %s6022_s26, 4  ;;  %p5970_p8 = scmp.ne.s32.totalorder %s6992_s1, %s5969_s30  ;;  %s29_s27 = int_to_ptr.vmem [resolvable:$true] %s28_s27 }
  0x15   :  { %p5973_p9 = scmp.lt.u32.totalorder %s5969_s30, %s6992_s1 }
  0x17   :  { %p5975_p10 = pnand %p5973_p9, %p5970_p8 }
  0x19   :  { %5978 = shalt.err (!%p5975_p10)
}
  0x1a   :  { %s5979_s8 = scalar_lea.vmem %s29_s27, 1024  ;;  %p5984_p12 = scmp.lt.s32.totalorder %s29_s27, %s29_s27 }
  0x1b   :  { %p5980_p11 = scmp.ne.s32.totalorder %s29_s27, %s5979_s8  ;;  %p5985_p13 = scmp.lt.s32.totalorder %s5979_s8, %s5979_s8 }
  0x1d   :  { %p5986_p0 = por %p5985_p13, %p5984_p12 }
  0x1f   :  { %p5987_p1 = pnand %p5986_p0, %p5980_p11 }
  0x21   :  { %5990 = shalt.err (!%p5987_p1)
}
  0x22   :  { %34 = dma.hbm_to_vmem [thread:$0]  %s6992_s1, 1024, %s29_s27, [#allocation6], %s6020_s22, %s6020_s22, %s6021_s23  }
  0x23   :  { %6013 = dma.done.wait [#allocation3], 256  }
  0x24   :  { %6014 = vsyncadd [#allocation3], 4294967040 }
  0x25   :  { %6015 = dma.done.wait [#allocation6], 1024  }
  0x26   :  { %6016 = vsyncadd [#allocation6], 4294966272  ;;  %vm56_vm0 = vcmask 261120   ;;  %v6086_v0 = vld [vmem:[#allocation5] sm:$0xff]  ;;  %v6088_v1 = vld [vmem:[#allocation5 + $0x8] sm:$0xff]  ;;  %s6023_s11 = smov 112   ;;  %v163_v16 = vlaneseq }
  0x27   :  { %v6090_v2 = vld [vmem:[#allocation5 + $0x10] sm:$0xff]  ;;  %v5859_v3 = vpack.i.bf16 %v6088_v1, %v6086_v0  ;;  %v5810_v4 = vpack.c.bf16 %v6088_v1, %v6086_v0  ;;  %v6096_v5 = vld [vmem:[#allocation5 + $0x18] sm:$0xff]  ;;  %s6024_s12 = smov 120   ;;  %s6025_s13 = smov 104   ;;  %v6027_v14 = vmov 1983009808  }
  0x28   :  { %v43_v6 = vld [vmem:[#allocation2] sm:$0xff]  ;;  %v5814_v7 = vpack.c.bf16 %v6096_v5, %v6090_v2  ;;  %v44_v8 = vld [vmem:[#allocation2 + $0x8] sm:$0xff]  ;;  %s6026_s14 = smov 96   ;;  %v161_v15 = vunpack.c.l.s4 %v6027_v14  ;;  %v164_v20 = vshrl.u32 %v163_v16, 7  ;;  %v6028_v21 = vmov 1934713408  }
  0x29   :  { %5614 = vmatprep.mubr.msk.f32.mxu0 %vm56_vm0, %v43_v6  ;;  %5811 = vmatprep.subr.bf16.mxu0 %v5810_v4  ;;  %v5435_v9 = vld [vmem:[%s6993_s2] ss:$0 sm:$0xff]  ;;  %v193_v22 = vunpack.c.l.s4 %v6028_v21  ;;  %s6029_s15 = smov 64   ;;  %v6030_v16 = vmov 0.0   ;;  %vm6031_vm1 = vmmov 0   ;;  %vm1022_vm2 = vcmask 64512  }
  0x2a   :  { %5813 = vmatpush3.bf16.msra.mxu0 %v5810_v4  ;;  %v162_v19 = vunpack.c.0.s8 %v161_v15  ;;  %5617 = vmatprep.subr.mxu1 %v6030_v16  ;;  %s6032_s16 = smov 32   ;;  %s6033_s17 = smov 16   ;;  %vm2625_vm3 = vcmask 130048   ;;  %vm2628_vm4 = vcmask 195584  }
  0x2b   :  { %5815 = vmatprep.subr.bf16.mxu0 %v5814_v7  ;;  %v194_v28 = vunpack.c.0.s8 %v193_v22  ;;  %5619 = vmatprep.mubr.msk.f32.mxu1 %vm6031_vm1, %v6030_v16  ;;  %s6034_s18 = smov 24  }
  0x2c   :  { %v6130_v25 = vsub.s32 %v162_v19, %v164_v20 }
  0x2d   :  { %v6152_v39 = vsub.s32 %v194_v28, %v164_v20 }
  0x2e   :  { %5817 = vmatpush3.bf16.msra.mxu0 %v5814_v7 }
  0x2f   :  { %5637 = vmatprep.subr.mxu0 %v6030_v16 }
  0x31   :  { %5615 = vmatmul.mubr.msk.f32.vlgmr.msra.gmra.mrb[0].mxu0 %vm56_vm0, %v44_v8 }
  0x32   :  { %5639 = vmatprep.mubr.msk.f32.mxu0 %vm6031_vm1, %v6030_v16 }
 0x104   :  { %v5616_v10 = vpop.f32.mrb[0].mxu0 }
 0x105   :  { %v6105_v11 = vadd.f32 %v5616_v10, %v5435_v9  ;;  %v129_v12 = vpop.f32.mrb[1].mxu0 }
 0x106   :  { %v130_v13 = vadd.f32 %v5435_v9, %v129_v12 }
 0x107   :  { %148 = vrot.lane.b32.xlu1 %v6105_v11, %s6023_s11  ;;  %142 = vrot.lane.b32.xlu0 %v6105_v11, %s6024_s12 }
 0x10b   :  { %146 = vrot.lane.b32.xlu1 %v130_v13, %s6023_s11  ;;  %140 = vrot.lane.b32.xlu0 %v130_v13, %s6024_s12 }
 0x10f   :  { %154 = vrot.lane.b32.xlu1 %v6105_v11, %s6025_s13  ;;  %152 = vrot.lane.b32.xlu0 %v130_v13, %s6025_s13 }
 0x113   :  { %432 = vrot.lane.b32.xlu1 %v6105_v11, %s6026_s14  ;;  %430 = vrot.lane.b32.xlu0 %v130_v13, %s6026_s14 }
 0x179   :  { %v6119_v17 = vpop.permute.xlu1 %148  ;;  %v143_v18 = vpop.permute.xlu0 %142 }
 0x17a   :  { %436 = vrot.lane.b32.xlu1 %v143_v18, %s6026_s14  ;;  %v226_v26 = vcombine.low %v6105_v11, %v6119_v17  ;;  %v227_v27 = vcombine.high %v6105_v11, %v6119_v17 }
 0x17c   :  { %v234_v37 = vrot.slane %v226_v26, %v6130_v25  ;;  %v241_v38 = vrot.slane %v227_v27, %v6130_v25 }
 0x17d   :  { %v6122_v23 = vpop.permute.xlu1 %146  ;;  %v6124_v24 = vpop.permute.xlu0 %140 }
 0x17e   :  { %440 = vrot.lane.b32.xlu1 %v6119_v17, %s6026_s14  ;;  %434 = vrot.lane.b32.xlu0 %v6124_v24, %s6026_s14  ;;  %v158_v29 = vcombine.low %v130_v13, %v6122_v23  ;;  %v159_v30 = vcombine.high %v130_v13, %v6122_v23 }
 0x180   :  { %v166_v44 = vrot.slane %v158_v29, %v6130_v25  ;;  %v173_v45 = vrot.slane %v159_v30, %v6130_v25 }
 0x181   :  { %v6138_v31 = vpop.permute.xlu1 %154  ;;  %v6140_v32 = vpop.permute.xlu0 %152 }
 0x182   :  { %v242_v33 = vcombine.low %v143_v18, %v6138_v31  ;;  %v243_v34 = vcombine.high %v143_v18, %v6138_v31  ;;  %v174_v35 = vcombine.low %v6124_v24, %v6140_v32  ;;  %v175_v36 = vcombine.high %v6124_v24, %v6140_v32  ;;  %444 = vrot.lane.b32.xlu1 %v6138_v31, %s6026_s14 }
 0x183   :  { %438 = vrot.lane.b32.xlu0 %v6122_v23, %s6026_s14 }
 0x184   :  { %v250_v40 = vrot.slane %v242_v33, %v6130_v25  ;;  %v257_v41 = vrot.slane %v243_v34, %v6130_v25  ;;  %v182_v42 = vrot.slane %v174_v35, %v6130_v25  ;;  %v189_v43 = vrot.slane %v175_v36, %v6130_v25 }
 0x186   :  { %v258_v46 = vcombine.low %v234_v37, %v250_v40  ;;  %v259_v47 = vcombine.high %v234_v37, %v250_v40  ;;  %v274_v48 = vcombine.low %v241_v38, %v257_v41  ;;  %v275_v49 = vcombine.high %v241_v38, %v257_v41  ;;  %726 = vrot.lane.b32.xlu1 %v130_v13, %s6029_s15 }
 0x187   :  { %v190_v50 = vcombine.low %v166_v44, %v182_v42  ;;  %v191_v51 = vcombine.high %v166_v44, %v182_v42  ;;  %v206_v52 = vcombine.low %v173_v45, %v189_v43  ;;  %v207_v53 = vcombine.high %v173_v45, %v189_v43  ;;  %442 = vrot.lane.b32.xlu0 %v6140_v32, %s6026_s14 }
 0x188   :  { %v266_v54 = vrot.slane %v258_v46, %v6152_v39  ;;  %v273_v55 = vrot.slane %v259_v47, %v6152_v39  ;;  %v282_v56 = vrot.slane %v274_v48, %v6152_v39  ;;  %v289_v57 = vrot.slane %v275_v49, %v6152_v39 }
 0x189   :  { %v198_v58 = vrot.slane %v190_v50, %v6152_v39  ;;  %v205_v59 = vrot.slane %v191_v51, %v6152_v39  ;;  %v214_v60 = vrot.slane %v206_v52, %v6152_v39  ;;  %v221_v61 = vrot.slane %v207_v53, %v6152_v39  ;;  %v433_v50 = vpop.permute.xlu1 %432  ;;  %v431_v51 = vpop.permute.xlu0 %430 }
 0x18a   :  { %v310_v62 = vcombine.low %v266_v54, %v282_v56  ;;  %v318_v63 = vcombine.low %v273_v55, %v289_v57  ;;  %v5440_v4 = vcombine.high %v266_v54, %v282_v56  ;;  %v5441_v6 = vcombine.high %v273_v55, %v289_v57  ;;  %732 = vrot.lane.b32.xlu1 %v143_v18, %s6029_s15 }
 0x18b   :  { %v294_v7 = vcombine.low %v198_v58, %v214_v60  ;;  %v302_v8 = vcombine.low %v205_v59, %v221_v61  ;;  %v5438_v9 = vcombine.high %v198_v58, %v214_v60  ;;  %v5439_v10 = vcombine.high %v205_v59, %v221_v61  ;;  %728 = vrot.lane.b32.xlu0 %v6105_v11, %s6029_s15 }
 0x18c   :  { %v385_v12 = vrot.slane %v5440_v4, %v6130_v25  ;;  %v393_v13 = vrot.slane %v5441_v6, %v6130_v25  ;;  %v317_v19 = vrot.slane %v310_v62, %v6130_v25  ;;  %v325_v20 = vrot.slane %v318_v63, %v6130_v25 }
 0x18d   :  { %v369_v14 = vrot.slane %v5438_v9, %v6130_v25  ;;  %v377_v15 = vrot.slane %v5439_v10, %v6130_v25  ;;  %v301_v18 = vrot.slane %v294_v7, %v6130_v25  ;;  %v309_v11 = vrot.slane %v302_v8, %v6130_v25 }
 0x18e   :  { %730 = vrot.lane.b32.xlu1 %v6124_v24, %s6029_s15  ;;  %v410_v22 = vcombine.low %v385_v12, %v393_v13  ;;  %v411_v27 = vcombine.high %v385_v12, %v393_v13  ;;  %v342_v24 = vcombine.low %v317_v19, %v325_v20  ;;  %v343_v30 = vcombine.high %v317_v19, %v325_v20 }
 0x18f   :  { %v394_v21 = vcombine.low %v369_v14, %v377_v15  ;;  %v395_v26 = vcombine.high %v369_v14, %v377_v15  ;;  %v326_v28 = vcombine.low %v301_v18, %v309_v11  ;;  %v327_v29 = vcombine.high %v301_v18, %v309_v11 }
 0x190   :  { %v6196_v34 = vrot.slane %v410_v22, %v6152_v39  ;;  %v6202_v36 = vrot.slane %v411_v27, %v6152_v39  ;;  %v6208_v38 = vrot.slane %v342_v24, %v6152_v39  ;;  %v6214_v41 = vrot.slane %v343_v30, %v6152_v39 }
 0x191   :  { %v6193_v33 = vrot.slane %v394_v21, %v6152_v39  ;;  %v6199_v35 = vrot.slane %v395_v26, %v6152_v39  ;;  %v6205_v37 = vrot.slane %v326_v28, %v6152_v39  ;;  %v6211_v40 = vrot.slane %v327_v29, %v6152_v39 }
 0x193   :  { %v426_v42 = vcombine.low %v6193_v33, %v6196_v34  ;;  %v428_v43 = vcombine.low %v6199_v35, %v6202_v36  ;;  %v427_v44 = vcombine.high %v6193_v33, %v6196_v34  ;;  %v429_v45 = vcombine.high %v6199_v35, %v6202_v36 }
 0x194   :  { %v358_v46 = vcombine.low %v6205_v37, %v6208_v38  ;;  %v359_v47 = vcombine.high %v6205_v37, %v6208_v38  ;;  %v360_v48 = vcombine.low %v6211_v40, %v6214_v41  ;;  %v361_v49 = vcombine.high %v6211_v40, %v6214_v41 }
 0x1ec   :  { %v437_v52 = vpop.permute.xlu1 %436 }
 0x1f0   :  { %v441_v53 = vpop.permute.xlu1 %440  ;;  %v435_v54 = vpop.permute.xlu0 %434 }
 0x1f1   :  { %v522_v55 = vcombine.low %v433_v50, %v441_v53  ;;  %v523_v56 = vcombine.high %v433_v50, %v441_v53 }
 0x1f3   :  { %v530_v61 = vrot.slane %v522_v55, %v6130_v25  ;;  %v537_v62 = vrot.slane %v523_v56, %v6130_v25 }
 0x1f4   :  { %v445_v57 = vpop.permute.xlu1 %444 }
 0x1f5   :  { %v538_v58 = vcombine.low %v437_v52, %v445_v57  ;;  %v539_v59 = vcombine.high %v437_v52, %v445_v57  ;;  %v439_v60 = vpop.permute.xlu0 %438 }
 0x1f6   :  { %v454_v6 = vcombine.low %v431_v51, %v439_v60  ;;  %v455_v7 = vcombine.high %v431_v51, %v439_v60 }
 0x1f7   :  { %v546_v63 = vrot.slane %v538_v58, %v6130_v25  ;;  %v553_v4 = vrot.slane %v539_v59, %v6130_v25 }
 0x1f8   :  { %v462_v21 = vrot.slane %v454_v6, %v6130_v25  ;;  %v469_v22 = vrot.slane %v455_v7, %v6130_v25 }
 0x1f9   :  { %v554_v8 = vcombine.low %v530_v61, %v546_v63  ;;  %v555_v9 = vcombine.high %v530_v61, %v546_v63  ;;  %v570_v10 = vcombine.low %v537_v62, %v553_v4  ;;  %v571_v12 = vcombine.high %v537_v62, %v553_v4  ;;  %v443_v13 = vpop.permute.xlu0 %442 }
 0x1fa   :  { %v470_v14 = vcombine.low %v435_v54, %v443_v13  ;;  %v471_v15 = vcombine.high %v435_v54, %v443_v13 }
 0x1fb   :  { %v562_v18 = vrot.slane %v554_v8, %v6152_v39  ;;  %v569_v11 = vrot.slane %v555_v9, %v6152_v39  ;;  %v578_v19 = vrot.slane %v570_v10, %v6152_v39  ;;  %v585_v20 = vrot.slane %v571_v12, %v6152_v39 }
 0x1fc   :  { %v478_v26 = vrot.slane %v470_v14, %v6130_v25  ;;  %v485_v27 = vrot.slane %v471_v15, %v6130_v25 }
 0x1fd   :  { %v606_v28 = vcombine.low %v562_v18, %v578_v19  ;;  %v614_v29 = vcombine.low %v569_v11, %v585_v20  ;;  %v5444_v24 = vcombine.high %v562_v18, %v578_v19  ;;  %v5445_v30 = vcombine.high %v569_v11, %v585_v20 }
 0x1fe   :  { %v486_v50 = vcombine.low %v462_v21, %v478_v26  ;;  %v487_v51 = vcombine.high %v462_v21, %v478_v26  ;;  %v502_v52 = vcombine.low %v469_v22, %v485_v27  ;;  %v503_v53 = vcombine.high %v469_v22, %v485_v27 }
 0x1ff   :  { %v681_v54 = vrot.slane %v5444_v24, %v6130_v25  ;;  %v689_v55 = vrot.slane %v5445_v30, %v6130_v25  ;;  %v613_v56 = vrot.slane %v606_v28, %v6130_v25  ;;  %v621_v57 = vrot.slane %v614_v29, %v6130_v25 }
 0x200   :  { %v494_v58 = vrot.slane %v486_v50, %v6152_v39  ;;  %v501_v59 = vrot.slane %v487_v51, %v6152_v39  ;;  %v510_v60 = vrot.slane %v502_v52, %v6152_v39  ;;  %v517_v61 = vrot.slane %v503_v53, %v6152_v39 }
 0x201   :  { %v706_v7 = vcombine.low %v681_v54, %v689_v55  ;;  %v638_v8 = vcombine.low %v613_v56, %v621_v57  ;;  %v707_v11 = vcombine.high %v681_v54, %v689_v55  ;;  %v639_v24 = vcombine.high %v613_v56, %v621_v57 }
 0x202   :  { %v590_v62 = vcombine.low %v494_v58, %v510_v60  ;;  %v598_v63 = vcombine.low %v501_v59, %v517_v61  ;;  %v5442_v4 = vcombine.high %v494_v58, %v510_v60  ;;  %v5443_v6 = vcombine.high %v501_v59, %v517_v61 }
 0x203   :  { %v646_v20 = vrot.slane %v638_v8, %v6152_v39  ;;  %v714_v22 = vrot.slane %v706_v7, %v6152_v39  ;;  %v721_v30 = vrot.slane %v707_v11, %v6152_v39  ;;  %v653_v53 = vrot.slane %v639_v24, %v6152_v39  ;;  %v6340_v7 = vpop.permute.xlu1 %726 }
 0x204   :  { %v665_v9 = vrot.slane %v5442_v4, %v6130_v25  ;;  %v673_v10 = vrot.slane %v5443_v6, %v6130_v25  ;;  %v597_v12 = vrot.slane %v590_v62, %v6130_v25  ;;  %v605_v13 = vrot.slane %v598_v63, %v6130_v25 }
 0x206   :  { %v690_v14 = vcombine.low %v665_v9, %v673_v10  ;;  %v691_v15 = vcombine.high %v665_v9, %v673_v10  ;;  %v622_v18 = vcombine.low %v597_v12, %v605_v13  ;;  %v623_v26 = vcombine.high %v597_v12, %v605_v13  ;;  %v6344_v9 = vpop.permute.xlu0 %728 }
 0x207   :  { %v6342_v8 = vpop.permute.xlu1 %732 }
 0x208   :  { %v630_v19 = vrot.slane %v622_v18, %v6152_v39  ;;  %v698_v21 = vrot.slane %v690_v14, %v6152_v39  ;;  %v705_v29 = vrot.slane %v691_v15, %v6152_v39  ;;  %v637_v52 = vrot.slane %v623_v26, %v6152_v39 }
 0x20a   :  { %v654_v27 = vcombine.low %v630_v19, %v646_v20  ;;  %v722_v28 = vcombine.low %v698_v21, %v714_v22  ;;  %v655_v50 = vcombine.high %v630_v19, %v646_v20  ;;  %v724_v51 = vcombine.low %v705_v29, %v721_v30 }
 0x20b   :  { %v723_v37 = vcombine.high %v698_v21, %v714_v22  ;;  %v725_v38 = vcombine.high %v705_v29, %v721_v30  ;;  %v6346_v10 = vpop.permute.xlu1 %730 }
 0x20c   :  { %5618 = vmatpush3.xpose.msk.msra.mxu1 %vm1022_vm2, %v654_v27  ;;  %5638 = vmatpush3.xpose.msk.msra.mxu0 %vm1022_vm2, %v722_v28 }
 0x20d   :  { %5622 = vmatprep.subr.mxu1 %v6030_v16  ;;  %5647 = vmatprep.subr.mxu0 %v6030_v16 }
 0x20f   :  { %5620 = vmatmul.mubr.msk.f32.vlgmr.msra.gmra.mrb[0].mxu1 %vm1022_vm2, %v358_v46  ;;  %5640 = vmatmul.mubr.msk.f32.vlgmr.msra.gmra.mrb[2].mxu0 %vm1022_vm2, %v426_v42  ;;  %v656_v46 = vcombine.low %v637_v52, %v653_v53  ;;  %v657_v42 = vcombine.high %v637_v52, %v653_v53 }
 0x210   :  { %5623 = vmatpush3.xpose.msk.msra.mxu1 %vm1022_vm2, %v655_v50  ;;  %5648 = vmatpush3.xpose.msk.msra.mxu0 %vm1022_vm2, %v724_v51 }
 0x211   :  { %5624 = vmatprep.mubr.msk.f32.mxu1 %vm6031_vm1, %v6030_v16  ;;  %5649 = vmatprep.mubr.msk.f32.mxu0 %vm6031_vm1, %v6030_v16 }
 0x212   :  { %5627 = vmatprep.subr.mxu1 %v6030_v16  ;;  %5657 = vmatprep.subr.mxu0 %v6030_v16 }
 0x213   :  { %5625 = vmatmul.mubr.msk.f32.vlgmr.msra.gmra.mrb[2].mxu1 %vm1022_vm2, %v359_v47  ;;  %5650 = vmatmul.mubr.msk.f32.vlgmr.msra.gmra.mrb[4].mxu0 %vm1022_vm2, %v428_v43 }
 0x214   :  { %5628 = vmatpush3.xpose.msk.msra.mxu1 %vm1022_vm2, %v656_v46  ;;  %5629 = vmatprep.mubr.msk.f32.mxu1 %vm6031_vm1, %v6030_v16 }
 0x215   :  { %5632 = vmatprep.subr.mxu1 %v6030_v16  ;;  %5659 = vmatprep.mubr.msk.f32.mxu0 %vm6031_vm1, %v6030_v16 }
 0x217   :  { %5630 = vmatmul.mubr.msk.f32.vlgmr.msra.gmra.mrb[4].mxu1 %vm1022_vm2, %v360_v48 }
 0x218   :  { %5633 = vmatpush3.xpose.msk.msra.mxu1 %vm1022_vm2, %v657_v42  ;;  %5634 = vmatprep.mubr.msk.f32.mxu1 %vm6031_vm1, %v6030_v16 }
 0x219   :  { %5642 = vmatprep.subr.mxu1 %v6030_v16 }
 0x21b   :  { %5635 = vmatmul.mubr.msk.f32.vlgmr.msra.gmra.mrb[6].mxu1 %vm1022_vm2, %v361_v49 }
 0x21c   :  { %5643 = vmatpush3.xpose.msk.msra.mxu1 %vm1022_vm2, %v723_v37  ;;  %5644 = vmatprep.mubr.msk.f32.mxu1 %vm6031_vm1, %v6030_v16 }
 0x21d   :  { %5652 = vmatprep.subr.mxu1 %v6030_v16 }
 0x21f   :  { %5645 = vmatmul.mubr.msk.f32.vlgmr.msra.gmra.mrb[8].mxu1 %vm1022_vm2, %v427_v44 }
 0x220   :  { %5653 = vmatpush3.xpose.msk.msra.mxu1 %vm1022_vm2, %v725_v38  ;;  %5654 = vmatprep.mubr.msk.f32.mxu1 %vm6031_vm1, %v6030_v16 }
 0x221   :  { %5662 = vmatprep.subr.mxu1 %v6030_v16 }
 0x223   :  { %5655 = vmatmul.mubr.msk.f32.vlgmr.msra.gmra.mrb[10].mxu1 %vm1022_vm2, %v429_v45 }
 0x224   :  { %5664 = vmatprep.mubr.msk.f32.mxu1 %vm6031_vm1, %v6030_v16 }
 0x2e2   :  { %v1095_v40 = vpop.f32.mrb[0].mxu1  ;;  %v1399_v41 = vpop.f32.mrb[2].mxu0 }
 0x2e3   :  { %v5621_v33 = vpop.f32.mrb[1].mxu1  ;;  %v5641_v34 = vpop.f32.mrb[3].mxu0  ;;  %v1643_v43 = vsel %vm1022_vm2, %v1399_v41, -inf  ;;  %v1631_v44 = vsel %vm1022_vm2, %v1095_v40, -inf }
 0x2e4   :  { %1644 = vmax.xlane.f32.xlu1 %v1643_v43  ;;  %1632 = vmax.xlane.f32.xlu0 %v1631_v44 }
 0x2e6   :  { %v1171_v47 = vpop.f32.mrb[2].mxu1  ;;  %v1551_v48 = vpop.f32.mrb[4].mxu0 }
 0x2e7   :  { %v5626_v49 = vpop.f32.mrb[3].mxu1  ;;  %v5651_v54 = vpop.f32.mrb[5].mxu0  ;;  %v1634_v35 = vsel %vm1022_vm2, %v1171_v47, -inf  ;;  %v1649_v55 = vsel %vm1022_vm2, %v1551_v48, -inf }
 0x2e8   :  { %1635 = vmax.xlane.f32.xlu1 %v1634_v35 }
 0x2ea   :  { %v1247_v36 = vpop.f32.mrb[4].mxu1 }
 0x2eb   :  { %v5631_v45 = vpop.f32.mrb[5].mxu1  ;;  %v1637_v56 = vsel %vm1022_vm2, %v1247_v36, -inf }
 0x2ec   :  { %1650 = vmax.xlane.f32.xlu1 %v1649_v55  ;;  %1638 = vmax.xlane.f32.xlu0 %v1637_v56 }
 0x2ee   :  { %v1323_v57 = vpop.f32.mrb[6].mxu1 }
 0x2ef   :  { %v5636_v58 = vpop.f32.mrb[7].mxu1  ;;  %v1640_v59 = vsel %vm1022_vm2, %v1323_v57, -inf }
 0x2f0   :  { %1641 = vmax.xlane.f32.xlu0 %v1640_v59 }
 0x2f2   :  { %v1475_v60 = vpop.f32.mrb[8].mxu1 }
 0x2f3   :  { %v5646_v61 = vpop.f32.mrb[9].mxu1  ;;  %v1646_v62 = vsel %vm1022_vm2, %v1475_v60, -inf }
 0x2f4   :  { %1647 = vmax.xlane.f32.xlu0 %v1646_v62 }
 0x2f6   :  { %v1627_v63 = vpop.f32.mrb[10].mxu1 }
 0x2f7   :  { %v5656_v4 = vpop.f32.mrb[11].mxu1  ;;  %v1652_v6 = vsel %vm1022_vm2, %v1627_v63, -inf }
 0x2f8   :  { %1653 = vmax.xlane.f32.xlu0 %v1652_v6 }
 0x2fd   :  { %736 = vrot.lane.b32.xlu1 %v6119_v17, %s6029_s15 }
 0x30e   :  { %734 = vrot.lane.b32.xlu0 %v6122_v23, %s6029_s15 }
 0x371   :  { %v1645_v12 = vpop.xlane.xlu1 %1644  ;;  %v1633_v13 = vpop.xlane.xlu0 %1632 }
 0x372   :  { %v1659_v14 = vsub.f32 %v1399_v41, %v1645_v12  ;;  %v1655_v15 = vsub.f32 %v1095_v40, %v1633_v13 }
 0x374   :  { %v1663_v18 = vmul.f32 1.442695, %v1655_v15  ;;  %v1671_v11 = vmul.f32 1.442695, %v1659_v14 }
 0x375   :  { %v1636_v19 = vpop.xlane.xlu1 %1635 }
 0x376   :  { %v1656_v20 = vsub.f32 %v1171_v47, %v1636_v19  ;;  %5879 = vpow2.f32 %v1663_v18 }
 0x377   :  { %5881 = vpow2.f32 %v1671_v11 }
 0x378   :  { %v1665_v17 = vmul.f32 1.442695, %v1656_v20 }
 0x379   :  { %v1651_v23 = vpop.xlane.xlu1 %1650  ;;  %v1639_v21 = vpop.xlane.xlu0 %1638 }
 0x37a   :  { %5883 = vpow2.f32 %v1665_v17  ;;  %v1661_v22 = vsub.f32 %v1551_v48, %v1651_v23  ;;  %v1657_v26 = vsub.f32 %v1247_v36, %v1639_v21 }
 0x37c   :  { %v1675_v27 = vmul.f32 1.442695, %v1661_v22  ;;  %v1667_v28 = vmul.f32 1.442695, %v1657_v26 }
 0x37d   :  { %v1642_v29 = vpop.xlane.xlu0 %1641  ;;  %v737_v56 = vpop.permute.xlu1 %736 }
 0x37e   :  { %5885 = vpow2.f32 %v1675_v27  ;;  %v1658_v24 = vsub.f32 %v1323_v57, %v1642_v29  ;;  %v818_v4 = vcombine.low %v6344_v9, %v737_v56  ;;  %v819_v6 = vcombine.high %v6344_v9, %v737_v56 }
 0x37f   :  { %5887 = vpow2.f32 %v1667_v28 }
 0x380   :  { %v1669_v30 = vmul.f32 1.442695, %v1658_v24  ;;  %v6348_v50 = vpop.eup %5879  ;;  %v826_v14 = vrot.slane %v818_v4, %v6130_v25  ;;  %v833_v15 = vrot.slane %v819_v6, %v6130_v25 }
 0x381   :  { %v1648_v51 = vpop.xlane.xlu0 %1647  ;;  %v1679_v53 = vsel %vm1022_vm2, %v6348_v50, 0.0  ;;  %v6352_v46 = vpop.eup %5881 }
 0x382   :  { %5889 = vpow2.f32 %v1669_v30  ;;  %v1660_v52 = vsub.f32 %v1475_v60, %v1648_v51  ;;  %1680 = vadd.xlane.f32.xlu1 %v1679_v53  ;;  %v1691_v33 = vsel %vm1022_vm2, %v6352_v46, 0.0 }
 0x384   :  { %v6354_v42 = vpop.eup %5883  ;;  %v1673_v37 = vmul.f32 1.442695, %v1660_v52 }
 0x385   :  { %v1654_v38 = vpop.xlane.xlu0 %1653  ;;  %v1682_v40 = vsel %vm1022_vm2, %v6354_v42, 0.0 }
 0x386   :  { %5891 = vpow2.f32 %v1673_v37  ;;  %v1662_v41 = vsub.f32 %v1627_v63, %v1654_v38  ;;  %1683 = vadd.xlane.f32.xlu0 %v1682_v40  ;;  %1692 = vadd.xlane.f32.xlu1 %v1691_v33 }
 0x388   :  { %v6360_v34 = vpop.eup %5885  ;;  %v1677_v43 = vmul.f32 1.442695, %v1662_v41 }
 0x389   :  { %v1697_v44 = vsel %vm1022_vm2, %v6360_v34, 0.0  ;;  %v6364_v47 = vpop.eup %5887  ;;  %v735_v58 = vpop.permute.xlu0 %734 }
 0x38a   :  { %5893 = vpow2.f32 %v1677_v43  ;;  %1698 = vadd.xlane.f32.xlu1 %v1697_v44  ;;  %v1685_v54 = vsel %vm1022_vm2, %v6364_v47, 0.0  ;;  %v750_v21 = vcombine.low %v6340_v7, %v735_v58 }
 0x38c   :  { %v6366_v48 = vpop.eup %5889 }
 0x38d   :  { %v1688_v49 = vsel %vm1022_vm2, %v6366_v48, 0.0 }
 0x38e   :  { %1689 = vadd.xlane.f32.xlu0 %v1688_v49  ;;  %1686 = vadd.xlane.f32.xlu1 %v1685_v54 }
 0x390   :  { %v6372_v35 = vpop.eup %5891 }
 0x391   :  { %v1694_v36 = vsel %vm1022_vm2, %v6372_v35, 0.0 }
 0x392   :  { %1695 = vadd.xlane.f32.xlu0 %v1694_v36 }
 0x394   :  { %v6376_v45 = vpop.eup %5893 }
 0x395   :  { %v1700_v55 = vsel %vm1022_vm2, %v6376_v45, 0.0 }
 0x396   :  { %1701 = vadd.xlane.f32.xlu0 %v1700_v55 }
 0x39f   :  { %740 = vrot.lane.b32.xlu1 %v6138_v31, %s6029_s15 }
 0x3ac   :  { %738 = vrot.lane.b32.xlu0 %v6140_v32, %s6029_s15 }
 0x3b0   :  { %5860 = vrot.lane.b32.xlu0 %v5859_v3, %s6032_s16 }
 0x40f   :  { %v1681_v57 = vpop.xlane.xlu1 %1680 }
 0x410   :  { %5895 = vrcp.f32 %v1681_v57 }
 0x413   :  { %v6384_v59 = vpop.xlane.xlu1 %1692  ;;  %v1684_v60 = vpop.xlane.xlu0 %1683 }
 0x414   :  { %5897 = vrcp.f32 %v1684_v60 }
 0x417   :  { %v6386_v61 = vpop.xlane.xlu1 %1698 }
 0x41a   :  { %v5896_v51 = vpop.eup %5895 }
 0x41b   :  { %v1690_v62 = vpop.xlane.xlu0 %1689  ;;  %v6388_v63 = vpop.xlane.xlu1 %1686  ;;  %v1711_v33 = vmul.f32 %v5896_v51, %v1681_v57 }
 0x41c   :  { %5899 = vrcp.f32 %v1690_v62 }
 0x41d   :  { %5901 = vrcp.f32 %v6388_v63 }
 0x41e   :  { %5903 = vrcp.f32 %v6384_v59  ;;  %v5898_v52 = vpop.eup %5897 }
 0x41f   :  { %v6392_v12 = vpop.xlane.xlu0 %1695  ;;  %v741_v31 = vpop.permute.xlu1 %740  ;;  %v1712_v44 = vmul.f32 %v5898_v52, %v1684_v60 }
 0x420   :  { %v834_v32 = vcombine.low %v6342_v8, %v741_v31  ;;  %v835_v13 = vcombine.high %v6342_v8, %v741_v31  ;;  %v751_v8 = vcombine.high %v6340_v7, %v735_v58  ;;  %v758_v7 = vrot.slane %v750_v21, %v6130_v25 }
 0x421   :  { %5905 = vrcp.f32 %v6392_v12  ;;  %v1720_v60 = vsub.f32 2.0, %v1712_v44 }
 0x422   :  { %v842_v18 = vrot.slane %v834_v32, %v6130_v25  ;;  %v849_v11 = vrot.slane %v835_v13, %v6130_v25  ;;  %v765_v37 = vrot.slane %v751_v8, %v6130_v25  ;;  %5907 = vrcp.f32 %v6386_v61 }
 0x423   :  { %v6400_v19 = vpop.xlane.xlu0 %1701  ;;  %v1719_v32 = vsub.f32 2.0, %v1711_v33 }
 0x424   :  { %v850_v9 = vcombine.low %v826_v14, %v842_v18  ;;  %v851_v20 = vcombine.high %v826_v14, %v842_v18  ;;  %v866_v17 = vcombine.low %v833_v15, %v849_v11  ;;  %v867_v23 = vcombine.high %v833_v15, %v849_v11 }
 0x425   :  { %5909 = vrcp.f32 %v6400_v19 }
 0x426   :  { %v858_v26 = vrot.slane %v850_v9, %v6152_v39  ;;  %v865_v28 = vrot.slane %v851_v20, %v6152_v39  ;;  %v874_v29 = vrot.slane %v866_v17, %v6152_v39  ;;  %v881_v24 = vrot.slane %v867_v23, %v6152_v39  ;;  %v5900_v56 = vpop.eup %5899 }
 0x427   :  { %v739_v22 = vpop.permute.xlu0 %738  ;;  %v5902_v31 = vpop.eup %5901  ;;  %v1714_v11 = vmul.f32 %v5900_v56, %v1690_v62 }
 0x428   :  { %v766_v27 = vcombine.low %v6346_v10, %v739_v22  ;;  %v767_v30 = vcombine.high %v6346_v10, %v739_v22  ;;  %v902_v38 = vcombine.low %v858_v26, %v874_v29  ;;  %v910_v40 = vcombine.low %v865_v28, %v881_v24  ;;  %v5904_v18 = vpop.eup %5903 }
 0x429   :  { %v5448_v9 = vcombine.high %v858_v26, %v874_v29  ;;  %v5449_v20 = vcombine.high %v865_v28, %v881_v24  ;;  %v1713_v23 = vmul.f32 %v5902_v31, %v6388_v63  ;;  %v1722_v29 = vsub.f32 2.0, %v1714_v11 }
 0x42a   :  { %v774_v53 = vrot.slane %v766_v27, %v6130_v25  ;;  %v781_v41 = vrot.slane %v767_v30, %v6130_v25  ;;  %v909_v58 = vrot.slane %v902_v38, %v6130_v25  ;;  %v917_v4 = vrot.slane %v910_v40, %v6130_v25 }
 0x42b   :  { %v5906_v27 = vpop.eup %5905  ;;  %v1727_v30 = vmul.f32 %v5896_v51, %v1719_v32  ;;  %v1728_v38 = vmul.f32 %v5898_v52, %v1720_v60  ;;  %v977_v63 = vrot.slane %v5448_v9, %v6130_v25  ;;  %v985_v24 = vrot.slane %v5449_v20, %v6130_v25 }
 0x42c   :  { %v782_v10 = vcombine.low %v758_v7, %v774_v53  ;;  %v783_v43 = vcombine.high %v758_v7, %v774_v53  ;;  %v798_v49 = vcombine.low %v765_v37, %v781_v41  ;;  %v799_v54 = vcombine.high %v765_v37, %v781_v41  ;;  %v5908_v28 = vpop.eup %5907 }
 0x42d   :  { %v934_v8 = vcombine.low %v909_v58, %v917_v4  ;;  %v1715_v37 = vmul.f32 %v5904_v18, %v6384_v59  ;;  %v935_v40 = vcombine.high %v909_v58, %v917_v4  ;;  %v1721_v41 = vsub.f32 2.0, %v1713_v23 }
 0x42e   :  { %v790_v36 = vrot.slane %v782_v10, %v6152_v39  ;;  %v797_v55 = vrot.slane %v783_v43, %v6152_v39  ;;  %v806_v57 = vrot.slane %v798_v49, %v6152_v39  ;;  %v813_v6 = vrot.slane %v799_v54, %v6152_v39 }
 0x42f   :  { %v1716_v33 = vmul.f32 %v5906_v27, %v6392_v12  ;;  %v942_v10 = vrot.slane %v934_v8, %v6152_v39  ;;  %v5910_v43 = vpop.eup %5909  ;;  %v1735_v59 = vmul.f32 %v6348_v50, %v1727_v30  ;;  %v1723_v49 = vsub.f32 2.0, %v1715_v37 }
 0x430   :  { %v886_v13 = vcombine.low %v790_v36, %v806_v57  ;;  %v894_v14 = vcombine.low %v797_v55, %v813_v6  ;;  %v5446_v15 = vcombine.high %v790_v36, %v806_v57  ;;  %v5447_v17 = vcombine.high %v797_v55, %v813_v6 }
 0x431   :  { %v1717_v54 = vmul.f32 %v5908_v28, %v6386_v61  ;;  %v1736_v58 = vmul.f32 %v6354_v42, %v1728_v38  ;;  %v1730_v4 = vmul.f32 %v5900_v56, %v1722_v29  ;;  %v949_v12 = vrot.slane %v935_v40, %v6152_v39 }
 0x432   :  { %v893_v21 = vrot.slane %v886_v13, %v6130_v25  ;;  %v901_v22 = vrot.slane %v894_v14, %v6130_v25  ;;  %v961_v7 = vrot.slane %v5446_v15, %v6130_v25  ;;  %v969_v53 = vrot.slane %v5447_v17, %v6130_v25 }
 0x433   :  { %v1002_v57 = vcombine.low %v977_v63, %v985_v24  ;;  %v1729_v6 = vmul.f32 %v5902_v31, %v1721_v41  ;;  %v1724_v32 = vsub.f32 2.0, %v1716_v33  ;;  %v1718_v60 = vmul.f32 %v5910_v43, %v6400_v19 }
 0x434   :  { %v918_v62 = vcombine.low %v893_v21, %v901_v22  ;;  %v919_v26 = vcombine.high %v893_v21, %v901_v22  ;;  %v986_v44 = vcombine.low %v961_v7, %v969_v53  ;;  %v987_v50 = vcombine.high %v961_v7, %v969_v53 }
 0x435   :  { %v1731_v42 = vmul.f32 %v5904_v18, %v1723_v49  ;;  %v1725_v56 = vsub.f32 2.0, %v1717_v54  ;;  %v1010_v19 = vrot.slane %v1002_v57, %v6152_v39  ;;  %v1003_v31 = vcombine.high %v977_v63, %v985_v24 }
 0x436   :  { %v926_v51 = vrot.slane %v918_v62, %v6152_v39  ;;  %v933_v52 = vrot.slane %v919_v26, %v6152_v39  ;;  %v994_v14 = vrot.slane %v986_v44, %v6152_v39  ;;  %v1737_v15 = vmul.f32 %v6364_v47, %v1729_v6  ;;  %v5861_v44 = vpop.permute.xlu0 %5860 }
 0x437   :  { %v1738_v11 = vmul.f32 %v6366_v48, %v1730_v4  ;;  %v1732_v9 = vmul.f32 %v5906_v27, %v1724_v32  ;;  %v1726_v20 = vsub.f32 2.0, %v1718_v60  ;;  %v1001_v23 = vrot.slane %v987_v50, %v6152_v39 }
 0x438   :  { %v950_v36 = vcombine.low %v926_v51, %v942_v10  ;;  %v951_v55 = vcombine.high %v926_v51, %v942_v10  ;;  %v952_v61 = vcombine.low %v933_v52, %v949_v12  ;;  %v953_v13 = vcombine.high %v933_v52, %v949_v12 }
 0x439   :  { %v1018_v18 = vcombine.low %v994_v14, %v1010_v19  ;;  %v1019_v17 = vcombine.high %v994_v14, %v1010_v19  ;;  %v1739_v47 = vmul.f32 %v6352_v46, %v1731_v42  ;;  %v1017_v48 = vrot.slane %v1003_v31, %v6152_v39 }
 0x43a   :  { %5658 = vmatpush3.msra.mxu0 %v950_v36  ;;  %5663 = vmatpush3.msra.mxu1 %v951_v55  ;;  %v1733_v21 = vmul.f32 %v5908_v28, %v1725_v56  ;;  %v1740_v22 = vmul.f32 %v6372_v35, %v1732_v9  ;;  %v1734_v8 = vmul.f32 %v5910_v43, %v1726_v20  ;;  %v5862_v14 = vunpack.i.l.bf16 %v5861_v44 }
 0x43b   :  { %5660 = vmatmul.mubr.msk.f32.vlgmr.msra.gmra.mrb[6].mxu0 %vm1022_vm2, %v1735_v59  ;;  %5665 = vmatmul.mubr.msk.f32.vlgmr.msra.gmra.mrb[12].mxu1 %vm1022_vm2, %v1736_v58  ;;  %v1020_v27 = vcombine.low %v1001_v23, %v1017_v48  ;;  %v1021_v46 = vcombine.high %v1001_v23, %v1017_v48  ;;  %v5864_v7 = vpack.i.bf16 %v6096_v5, %v6090_v2 }
 0x43c   :  { %5667 = vmatprep.subr.mxu0 %v6030_v16  ;;  %5672 = vmatprep.subr.mxu1 %v6030_v16  ;;  %v1741_v35 = vmul.f32 %v6360_v34, %v1733_v21  ;;  %v1742_v30 = vmul.f32 %v6376_v45, %v1734_v8 }
 0x43d   :  { %5668 = vmatpush3.msra.mxu0 %v952_v61  ;;  %5673 = vmatpush3.msra.mxu1 %v953_v13  ;;  %v5863_v13 = vunpack.i.h.bf16 %v5861_v44 }
 0x43e   :  { %5669 = vmatprep.mubr.msk.f32.mxu0 %vm6031_vm1, %v6030_v16  ;;  %5674 = vmatprep.mubr.msk.f32.mxu1 %vm6031_vm1, %v6030_v16 }
 0x43f   :  { %5677 = vmatprep.subr.mxu0 %v6030_v16  ;;  %5682 = vmatprep.subr.mxu1 %v6030_v16 }
 0x440   :  { %5670 = vmatmul.mubr.msk.f32.vlgmr.msra.gmra.mrb[8].mxu0 %vm1022_vm2, %v1737_v15  ;;  %5675 = vmatmul.mubr.msk.f32.vlgmr.msra.gmra.mrb[14].mxu1 %vm1022_vm2, %v1738_v11 }
 0x441   :  { %5678 = vmatpush3.msra.mxu0 %v1018_v18  ;;  %5683 = vmatpush3.msra.mxu1 %v1019_v17 }
 0x442   :  { %5679 = vmatprep.mubr.msk.f32.mxu0 %vm6031_vm1, %v6030_v16  ;;  %5684 = vmatprep.mubr.msk.f32.mxu1 %vm6031_vm1, %v6030_v16 }
 0x443   :  { %5687 = vmatprep.subr.mxu0 %v6030_v16  ;;  %5692 = vmatprep.subr.mxu1 %v6030_v16 }
 0x444   :  { %5680 = vmatmul.mubr.msk.f32.vlgmr.msra.gmra.mrb[10].mxu0 %vm1022_vm2, %v1739_v47  ;;  %5685 = vmatmul.mubr.msk.f32.vlgmr.msra.gmra.mrb[16].mxu1 %vm1022_vm2, %v1740_v22  ;;  %v5818_v22 = vpack.c.bf16 %v5863_v13, %v5862_v14 }
 0x445   :  { %5688 = vmatpush3.msra.mxu0 %v1020_v27  ;;  %5693 = vmatpush3.msra.mxu1 %v1021_v46 }
 0x446   :  { %5689 = vmatprep.mubr.msk.f32.mxu0 %vm6031_vm1, %v6030_v16  ;;  %5694 = vmatprep.mubr.msk.f32.mxu1 %vm6031_vm1, %v6030_v16 }
 0x447   :  { %5865 = vrot.lane.b32.xlu1 %v5864_v7, %s6032_s16  ;;  %5819 = vmatprep.subr.bf16.mxu0 %v5818_v22 }
 0x448   :  { %5690 = vmatmul.mubr.msk.f32.vlgmr.msra.gmra.mrb[12].mxu0 %vm1022_vm2, %v1741_v35  ;;  %5695 = vmatmul.mubr.msk.f32.vlgmr.msra.gmra.mrb[18].mxu1 %vm1022_vm2, %v1742_v30 }
 0x449   :  { %5821 = vmatpush3.bf16.msra.mxu0 %v5818_v22 }
 0x4b9   :  { %v5866_v49 = vpop.permute.xlu1 %5865 }
 0x4ba   :  { %v5868_v42 = vunpack.i.h.bf16 %v5866_v49  ;;  %v5867_v56 = vunpack.i.l.bf16 %v5866_v49 }
 0x4bc   :  { %v5822_v8 = vpack.c.bf16 %v5868_v42, %v5867_v56 }
 0x4be   :  { %5823 = vmatprep.subr.bf16.mxu0 %v5822_v8 }
 0x4bf   :  { %5825 = vmatpush3.bf16.msra.mxu0 %v5822_v8 }
 0x4c0   :  { %5719 = vmatprep.subr.mxu0 %v6030_v16 }
 0x50e   :  { %v1812_v34 = vpop.f32.mrb[6].mxu0  ;;  %v1885_v45 = vpop.f32.mrb[12].mxu1 }
 0x50f   :  { %v5661_v53 = vpop.f32.mrb[7].mxu0  ;;  %v5666_v37 = vpop.f32.mrb[13].mxu1 }
 0x513   :  { %v1958_v38 = vpop.f32.mrb[8].mxu0  ;;  %v2031_v62 = vpop.f32.mrb[14].mxu1 }
 0x514   :  { %v2327_v26 = vcombine.low %v1812_v34, %v1958_v38  ;;  %v2328_v28 = vcombine.high %v1812_v34, %v1958_v38  ;;  %v2343_v29 = vcombine.low %v1885_v45, %v2031_v62  ;;  %v2344_v63 = vcombine.high %v1885_v45, %v2031_v62  ;;  %v5671_v24 = vpop.f32.mrb[9].mxu0  ;;  %v5676_v2 = vpop.f32.mrb[15].mxu1 }
 0x516   :  { %v2335_v5 = vrot.slane %v2327_v26, %v6130_v25  ;;  %v2342_v40 = vrot.slane %v2328_v28, %v6130_v25  ;;  %v2351_v0 = vrot.slane %v2343_v29, %v6130_v25  ;;  %v2358_v1 = vrot.slane %v2344_v63, %v6130_v25 }
 0x517   :  { %v2104_v3 = vpop.f32.mrb[10].mxu0  ;;  %v2177_v41 = vpop.f32.mrb[16].mxu1 }
 0x518   :  { %v2359_v33 = vcombine.low %v2335_v5, %v2351_v0  ;;  %v2360_v51 = vcombine.high %v2335_v5, %v2351_v0  ;;  %v2375_v10 = vcombine.low %v2342_v40, %v2358_v1  ;;  %v2376_v43 = vcombine.high %v2342_v40, %v2358_v1  ;;  %v5681_v59 = vpop.f32.mrb[11].mxu0  ;;  %v5686_v52 = vpop.f32.mrb[17].mxu1 }
 0x51a   :  { %v2367_v55 = vrot.slane %v2359_v33, %v6152_v39  ;;  %v2374_v58 = vrot.slane %v2360_v51, %v6152_v39  ;;  %v2383_v4 = vrot.slane %v2375_v10, %v6152_v39  ;;  %v2390_v12 = vrot.slane %v2376_v43, %v6152_v39 }
 0x51b   :  { %v2250_v54 = vpop.f32.mrb[12].mxu0  ;;  %v2323_v36 = vpop.f32.mrb[18].mxu1 }
 0x51c   :  { %v5691_v57 = vpop.f32.mrb[13].mxu0  ;;  %v5696_v6 = vpop.f32.mrb[19].mxu1  ;;  %v2395_v32 = vcombine.low %v2104_v3, %v2250_v54  ;;  %v2396_v60 = vcombine.high %v2104_v3, %v2250_v54  ;;  %v2411_v50 = vcombine.low %v2177_v41, %v2323_v36  ;;  %v2412_v61 = vcombine.high %v2177_v41, %v2323_v36 }
 0x51d   :  { %v2391_v9 = vcombine.high %v2367_v55, %v6030_v16  ;;  %v2392_v20 = vcombine.high %v2374_v58, %v6030_v16  ;;  %v2393_v18 = vcombine.high %v2383_v4, %v6030_v16  ;;  %v2394_v17 = vcombine.high %v2390_v12, %v6030_v16 }
 0x51e   :  { %v2403_v19 = vrot.slane %v2395_v32, %v6130_v25  ;;  %v2410_v31 = vrot.slane %v2396_v60, %v6130_v25  ;;  %v2419_v15 = vrot.slane %v2411_v50, %v6130_v25  ;;  %v2426_v11 = vrot.slane %v2412_v61, %v6130_v25  ;;  %v2732_v60 = vld [vmem:[#allocation5 + $0x20] sm:$0xff]  ;;  %v2733_v50 = vld [vmem:[#allocation5 + $0x28] sm:$0xff] }
 0x51f   :  { %v2531_v7 = vcombine.low %v2383_v4, %v2393_v18  ;;  %v2547_v34 = vcombine.low %v2390_v12, %v2394_v17  ;;  %v2463_v45 = vcombine.low %v2367_v55, %v2391_v9  ;;  %v2479_v53 = vcombine.low %v2374_v58, %v2392_v20  ;;  %v5943_v9 = vld [vmem:[%s6993_s2] ss:$0 sm:$0xff] }
 0x520   :  { %v2427_v23 = vcombine.low %v2403_v19, %v2419_v15  ;;  %v2428_v47 = vcombine.high %v2403_v19, %v2419_v15  ;;  %v2443_v48 = vcombine.low %v2410_v31, %v2426_v11  ;;  %v2444_v21 = vcombine.high %v2410_v31, %v2426_v11 }
 0x521   :  { %v2538_v2 = vrot.slane %v2531_v7, %v6130_v25  ;;  %v2554_v5 = vrot.slane %v2547_v34, %v6130_v25  ;;  %v2470_v40 = vrot.slane %v2463_v45, %v6130_v25  ;;  %v2486_v0 = vrot.slane %v2479_v53, %v6130_v25  ;;  %v6548_v7 = vld [vmem:[#allocation5 + $0x38] sm:$0xff] }
 0x522   :  { %v2435_v27 = vrot.slane %v2427_v23, %v6152_v39  ;;  %v2442_v46 = vrot.slane %v2428_v47, %v6152_v39  ;;  %v2451_v35 = vrot.slane %v2443_v48, %v6152_v39  ;;  %v2458_v30 = vrot.slane %v2444_v21, %v6152_v39 }
 0x523   :  { %v5826_v11 = vpack.c.bf16 %v2733_v50, %v2732_v60 }
 0x524   :  { %v2459_v37 = vcombine.high %v2435_v27, %v6030_v16  ;;  %v2460_v38 = vcombine.high %v2442_v46, %v6030_v16  ;;  %v2461_v62 = vcombine.high %v2451_v35, %v6030_v16  ;;  %v2462_v26 = vcombine.high %v2458_v30, %v6030_v16 }
 0x525   :  { %5827 = vmatprep.subr.bf16.mxu1 %v5826_v11 }
 0x526   :  { %v2539_v28 = vcombine.low %v2451_v35, %v2461_v62  ;;  %v2555_v29 = vcombine.low %v2458_v30, %v2462_v26  ;;  %v2471_v63 = vcombine.low %v2435_v27, %v2459_v37  ;;  %v2487_v24 = vcombine.low %v2442_v46, %v2460_v38  ;;  %5829 = vmatpush3.bf16.msra.mxu1 %v5826_v11  ;;  %v6546_v30 = vld [vmem:[#allocation5 + $0x30] sm:$0xff] }
 0x527   :  { %v5830_v34 = vpack.c.bf16 %v6548_v7, %v6546_v30  ;;  %v5477_v26 = vld [vmem:[%s6993_s2 + $0x1] ss:$0 sm:$0xff] }
 0x528   :  { %v2546_v1 = vrot.slane %v2539_v28, %v6130_v25  ;;  %v2562_v3 = vrot.slane %v2555_v29, %v6130_v25  ;;  %v2478_v41 = vrot.slane %v2471_v63, %v6130_v25  ;;  %v2494_v33 = vrot.slane %v2487_v24, %v6130_v25 }
 0x529   :  { %5831 = vmatprep.subr.bf16.mxu1 %v5830_v34 }
 0x52a   :  { %v2563_v51 = vcombine.low %v2538_v2, %v2546_v1  ;;  %v2579_v10 = vcombine.low %v2554_v5, %v2562_v3  ;;  %v2495_v43 = vcombine.low %v2470_v40, %v2478_v41  ;;  %v2511_v59 = vcombine.low %v2486_v0, %v2494_v33  ;;  %5833 = vmatpush3.bf16.msra.mxu1 %v5830_v34 }
 0x52b   :  { %v2564_v52 = vcombine.high %v2538_v2, %v2546_v1  ;;  %v2580_v44 = vcombine.high %v2554_v5, %v2562_v3  ;;  %v2496_v49 = vcombine.high %v2470_v40, %v2478_v41  ;;  %v2512_v54 = vcombine.high %v2486_v0, %v2494_v33  ;;  %5724 = vmatprep.subr.mxu1 %v6030_v16 }
 0x52c   :  { %v2571_v36 = vrot.slane %v2563_v51, %v6152_v39  ;;  %v2587_v55 = vrot.slane %v2579_v10, %v6152_v39  ;;  %v2503_v58 = vrot.slane %v2495_v43, %v6152_v39  ;;  %v2519_v4 = vrot.slane %v2511_v59, %v6152_v39 }
 0x52d   :  { %v2578_v12 = vrot.slane %v2564_v52, %v6152_v39  ;;  %v2594_v57 = vrot.slane %v2580_v44, %v6152_v39  ;;  %v2510_v6 = vrot.slane %v2496_v49, %v6152_v39  ;;  %v2526_v32 = vrot.slane %v2512_v54, %v6152_v39 }
 0x52e   :  { %v2596_v61 = vcombine.high %v2571_v36, %v2587_v55  ;;  %v2595_v13 = vcombine.low %v2571_v36, %v2587_v55  ;;  %v2528_v14 = vcombine.high %v2503_v58, %v2519_v4  ;;  %v2527_v42 = vcombine.low %v2503_v58, %v2519_v4 }
 0x52f   :  { %v2597_v56 = vcombine.low %v2578_v12, %v2594_v57  ;;  %v2529_v19 = vcombine.low %v2510_v6, %v2526_v32  ;;  %v2598_v31 = vcombine.high %v2578_v12, %v2594_v57  ;;  %v2530_v15 = vcombine.high %v2510_v6, %v2526_v32 }
 0x530   :  { %2603 = vrot.lane.b32.xlu1 %v2596_v61, %s6021_s23  ;;  %2601 = vrot.lane.b32.xlu0 %v2528_v14, %s6021_s23 }
 0x534   :  { %2611 = vrot.lane.b32.xlu1 %v2597_v56, %s6033_s17  ;;  %2609 = vrot.lane.b32.xlu0 %v2529_v19, %s6033_s17 }
 0x538   :  { %2619 = vrot.lane.b32.xlu1 %v2598_v31, %s6034_s18  ;;  %2617 = vrot.lane.b32.xlu0 %v2530_v15, %s6034_s18 }
 0x53c   :  { %2647 = vrot.lane.b32.xlu0 %v5943_v9, %s6032_s16 }
 0x5a2   :  { %v2604_v20 = vpop.permute.xlu1 %2603  ;;  %v2602_v18 = vpop.permute.xlu0 %2601 }
 0x5a3   :  { %v2624_v47 = vsel %vm1022_vm2, %v2595_v13, %v2604_v20  ;;  %v2623_v48 = vsel %vm1022_vm2, %v2527_v42, %v2602_v18 }
 0x5a6   :  { %v2612_v17 = vpop.permute.xlu1 %2611  ;;  %v2610_v23 = vpop.permute.xlu0 %2609 }
 0x5a7   :  { %v2627_v21 = vsel %vm2625_vm3, %v2624_v47, %v2612_v17  ;;  %v2626_v22 = vsel %vm2625_vm3, %v2623_v48, %v2610_v23 }
 0x5aa   :  { %v2620_v8 = vpop.permute.xlu1 %2619  ;;  %v2618_v27 = vpop.permute.xlu0 %2617 }
 0x5ab   :  { %v2630_v46 = vsel %vm2628_vm4, %v2627_v21, %v2620_v8  ;;  %v2629_v35 = vsel %vm2628_vm4, %v2626_v22, %v2618_v27 }
 0x5ac   :  { %5705 = vmatprep.mubr.msk.f32.mxu0 %vm56_vm0, %v2629_v35 }
 0x5ad   :  { %5706 = vmatmul.mubr.msk.f32.vlgmr.msra.gmra.mrb[14].mxu0 %vm56_vm0, %v2630_v46 }
 0x5ae   :  { %5721 = vmatprep.mubr.msk.f32.mxu0 %vm6031_vm1, %v6030_v16  ;;  %v2648_v45 = vpop.permute.xlu0 %2647 }
 0x680   :  { %v5707_v53 = vpop.f32.mrb[14].mxu0 }
 0x681   :  { %v2722_v37 = vpop.f32.mrb[15].mxu0  ;;  %v2728_v62 = vadd.f32 %v5707_v53, %v2648_v45 }
 0x682   :  { %v2723_v38 = vadd.f32 %v2722_v37, %v2648_v45 }
 0x684   :  { %5716 = vmatprep.mubr.msk.f32.mxu1 %vm56_vm0, %v2723_v38 }
 0x685   :  { %5717 = vmatmul.mubr.msk.f32.vlgmr.msra.gmra.mrb[20].mxu1 %vm56_vm0, %v2728_v62 }
 0x686   :  { %5726 = vmatprep.mubr.msk.f32.mxu1 %vm6031_vm1, %v6030_v16 }
 0x758   :  { %v5718_v28 = vpop.f32.mrb[20].mxu1 }
 0x759   :  { %v2822_v29 = vadd.f32 %v5718_v28, %v5477_v26  ;;  %v2816_v63 = vpop.f32.mrb[21].mxu1 }
 0x75a   :  { %v2817_v24 = vadd.f32 %v5477_v26, %v2816_v63 }
 0x75b   :  { %2829 = vrot.lane.b32.xlu0 %v2822_v29, %s6024_s12 }
 0x75c   :  { %2827 = vrot.lane.b32.xlu1 %v2817_v24, %s6024_s12 }
 0x75f   :  { %2835 = vrot.lane.b32.xlu0 %v2822_v29, %s6023_s11 }
 0x760   :  { %2833 = vrot.lane.b32.xlu1 %v2817_v24, %s6023_s11 }
 0x763   :  { %2841 = vrot.lane.b32.xlu0 %v2822_v29, %s6025_s13 }
 0x764   :  { %2839 = vrot.lane.b32.xlu1 %v2817_v24, %s6025_s13 }
 0x767   :  { %3119 = vrot.lane.b32.xlu0 %v2822_v29, %s6026_s14 }
 0x768   :  { %3117 = vrot.lane.b32.xlu1 %v2817_v24, %s6026_s14 }
 0x7cd   :  { %v2830_v2 = vpop.permute.xlu0 %2829 }
 0x7ce   :  { %3123 = vrot.lane.b32.xlu0 %v2830_v2, %s6026_s14  ;;  %v2828_v5 = vpop.permute.xlu1 %2827 }
 0x7cf   :  { %3121 = vrot.lane.b32.xlu1 %v2828_v5, %s6026_s14 }
 0x7d1   :  { %v6570_v40 = vpop.permute.xlu0 %2835 }
 0x7d2   :  { %3127 = vrot.lane.b32.xlu0 %v6570_v40, %s6026_s14  ;;  %v6574_v0 = vpop.permute.xlu1 %2833  ;;  %v2913_v1 = vcombine.low %v2822_v29, %v6570_v40  ;;  %v2914_v3 = vcombine.high %v2822_v29, %v6570_v40 }
 0x7d3   :  { %3125 = vrot.lane.b32.xlu1 %v6574_v0, %s6026_s14  ;;  %v2845_v41 = vcombine.low %v2817_v24, %v6574_v0  ;;  %v2846_v33 = vcombine.high %v2817_v24, %v6574_v0 }
 0x7d4   :  { %v2921_v49 = vrot.slane %v2913_v1, %v6130_v25  ;;  %v2928_v54 = vrot.slane %v2914_v3, %v6130_v25 }
 0x7d5   :  { %v6582_v51 = vpop.permute.xlu0 %2841  ;;  %v2853_v58 = vrot.slane %v2845_v41, %v6130_v25  ;;  %v2860_v4 = vrot.slane %v2846_v33, %v6130_v25 }
 0x7d6   :  { %v2929_v10 = vcombine.low %v2830_v2, %v6582_v51  ;;  %v2930_v43 = vcombine.high %v2830_v2, %v6582_v51  ;;  %3131 = vrot.lane.b32.xlu0 %v6582_v51, %s6026_s14  ;;  %v6588_v59 = vpop.permute.xlu1 %2839 }
 0x7d7   :  { %v2861_v52 = vcombine.low %v2828_v5, %v6588_v59  ;;  %v2862_v44 = vcombine.high %v2828_v5, %v6588_v59  ;;  %3129 = vrot.lane.b32.xlu1 %v6588_v59, %s6026_s14 }
 0x7d8   :  { %v2937_v36 = vrot.slane %v2929_v10, %v6130_v25  ;;  %v2944_v55 = vrot.slane %v2930_v43, %v6130_v25 }
 0x7d9   :  { %v2869_v12 = vrot.slane %v2861_v52, %v6130_v25  ;;  %v2876_v57 = vrot.slane %v2862_v44, %v6130_v25 }
 0x7da   :  { %v2945_v6 = vcombine.low %v2921_v49, %v2937_v36  ;;  %v2946_v32 = vcombine.high %v2921_v49, %v2937_v36  ;;  %v2961_v60 = vcombine.low %v2928_v54, %v2944_v55  ;;  %v2962_v50 = vcombine.high %v2928_v54, %v2944_v55  ;;  %3413 = vrot.lane.b32.xlu0 %v2817_v24, %s6029_s15 }
 0x7db   :  { %v2877_v61 = vcombine.low %v2853_v58, %v2869_v12  ;;  %v2878_v13 = vcombine.high %v2853_v58, %v2869_v12  ;;  %v2893_v14 = vcombine.low %v2860_v4, %v2876_v57  ;;  %v2894_v42 = vcombine.high %v2860_v4, %v2876_v57  ;;  %3415 = vrot.lane.b32.xlu1 %v2822_v29, %s6029_s15 }
 0x7dc   :  { %v2953_v56 = vrot.slane %v2945_v6, %v6152_v39  ;;  %v2960_v19 = vrot.slane %v2946_v32, %v6152_v39  ;;  %v2969_v31 = vrot.slane %v2961_v60, %v6152_v39  ;;  %v2976_v15 = vrot.slane %v2962_v50, %v6152_v39  ;;  %v3120_v32 = vpop.permute.xlu0 %3119  ;;  %v3118_v60 = vpop.permute.xlu1 %3117 }
 0x7dd   :  { %v2885_v11 = vrot.slane %v2877_v61, %v6152_v39  ;;  %v2892_v9 = vrot.slane %v2878_v13, %v6152_v39  ;;  %v2901_v20 = vrot.slane %v2893_v14, %v6152_v39  ;;  %v2908_v18 = vrot.slane %v2894_v42, %v6152_v39 }
 0x7de   :  { %v2997_v17 = vcombine.low %v2953_v56, %v2969_v31  ;;  %v3005_v23 = vcombine.low %v2960_v19, %v2976_v15  ;;  %v5482_v47 = vcombine.high %v2953_v56, %v2969_v31  ;;  %v5483_v48 = vcombine.high %v2960_v19, %v2976_v15  ;;  %3419 = vrot.lane.b32.xlu0 %v2830_v2, %s6029_s15 }
 0x7df   :  { %v2981_v21 = vcombine.low %v2885_v11, %v2901_v20  ;;  %v2989_v22 = vcombine.low %v2892_v9, %v2908_v18  ;;  %v5480_v8 = vcombine.high %v2885_v11, %v2901_v20  ;;  %v5481_v27 = vcombine.high %v2892_v9, %v2908_v18  ;;  %3417 = vrot.lane.b32.xlu1 %v2828_v5, %s6029_s15 }
 0x7e0   :  { %v3004_v46 = vrot.slane %v2997_v17, %v6130_v25  ;;  %v3012_v35 = vrot.slane %v3005_v23, %v6130_v25  ;;  %v3072_v34 = vrot.slane %v5482_v47, %v6130_v25  ;;  %v3080_v45 = vrot.slane %v5483_v48, %v6130_v25 }
 0x7e1   :  { %v2988_v53 = vrot.slane %v2981_v21, %v6130_v25  ;;  %v2996_v37 = vrot.slane %v2989_v22, %v6130_v25  ;;  %v3056_v38 = vrot.slane %v5480_v8, %v6130_v25  ;;  %v3064_v62 = vrot.slane %v5481_v27, %v6130_v25 }
 0x7e2   :  { %v3029_v26 = vcombine.low %v3004_v46, %v3012_v35  ;;  %v3030_v28 = vcombine.high %v3004_v46, %v3012_v35  ;;  %v3097_v29 = vcombine.low %v3072_v34, %v3080_v45  ;;  %v3098_v63 = vcombine.high %v3072_v34, %v3080_v45 }
 0x7e3   :  { %v3013_v24 = vcombine.low %v2988_v53, %v2996_v37  ;;  %v3014_v2 = vcombine.high %v2988_v53, %v2996_v37  ;;  %v3081_v5 = vcombine.low %v3056_v38, %v3064_v62  ;;  %v3082_v1 = vcombine.high %v3056_v38, %v3064_v62 }
 0x7e4   :  { %v6623_v3 = vrot.slane %v3029_v26, %v6152_v39  ;;  %v6626_v41 = vrot.slane %v3030_v28, %v6152_v39  ;;  %v6629_v33 = vrot.slane %v3097_v29, %v6152_v39  ;;  %v6632_v10 = vrot.slane %v3098_v63, %v6152_v39 }
 0x7e5   :  { %v6635_v43 = vrot.slane %v3013_v24, %v6152_v39  ;;  %v6638_v52 = vrot.slane %v3014_v2, %v6152_v39  ;;  %v6641_v44 = vrot.slane %v3081_v5, %v6152_v39  ;;  %v6644_v49 = vrot.slane %v3082_v1, %v6152_v39 }
 0x7e7   :  { %v3045_v54 = vcombine.low %v6635_v43, %v6623_v3  ;;  %v3046_v36 = vcombine.high %v6635_v43, %v6623_v3  ;;  %v3047_v55 = vcombine.low %v6638_v52, %v6626_v41  ;;  %v3048_v58 = vcombine.high %v6638_v52, %v6626_v41 }
 0x7e8   :  { %v3113_v4 = vcombine.low %v6641_v44, %v6629_v33  ;;  %v3114_v12 = vcombine.high %v6641_v44, %v6629_v33  ;;  %v3115_v57 = vcombine.low %v6644_v49, %v6632_v10  ;;  %v3116_v6 = vcombine.high %v6644_v49, %v6632_v10 }
 0x840   :  { %v3124_v50 = vpop.permute.xlu0 %3123 }
 0x841   :  { %v3122_v61 = vpop.permute.xlu1 %3121 }
 0x844   :  { %v3128_v13 = vpop.permute.xlu0 %3127 }
 0x845   :  { %v3126_v14 = vpop.permute.xlu1 %3125  ;;  %v3209_v42 = vcombine.low %v3120_v32, %v3128_v13  ;;  %v3210_v56 = vcombine.high %v3120_v32, %v3128_v13 }
 0x846   :  { %v3141_v19 = vcombine.low %v3118_v60, %v3126_v14  ;;  %v3142_v31 = vcombine.high %v3118_v60, %v3126_v14 }
 0x847   :  { %v3217_v23 = vrot.slane %v3209_v42, %v6130_v25  ;;  %v3224_v47 = vrot.slane %v3210_v56, %v6130_v25 }
 0x848   :  { %v3132_v15 = vpop.permute.xlu0 %3131  ;;  %v3149_v22 = vrot.slane %v3141_v19, %v6130_v25  ;;  %v3156_v8 = vrot.slane %v3142_v31, %v6130_v25 }
 0x849   :  { %v3225_v11 = vcombine.low %v3124_v50, %v3132_v15  ;;  %v3226_v9 = vcombine.high %v3124_v50, %v3132_v15  ;;  %v3130_v20 = vpop.permute.xlu1 %3129 }
 0x84a   :  { %v3157_v18 = vcombine.low %v3122_v61, %v3130_v20  ;;  %v3158_v17 = vcombine.high %v3122_v61, %v3130_v20 }
 0x84b   :  { %v3233_v48 = vrot.slane %v3225_v11, %v6130_v25  ;;  %v3240_v21 = vrot.slane %v3226_v9, %v6130_v25 }
 0x84c   :  { %v3165_v27 = vrot.slane %v3157_v18, %v6130_v25  ;;  %v3172_v46 = vrot.slane %v3158_v17, %v6130_v25 }
 0x84d   :  { %v3241_v35 = vcombine.low %v3217_v23, %v3233_v48  ;;  %v3242_v34 = vcombine.high %v3217_v23, %v3233_v48  ;;  %v3257_v45 = vcombine.low %v3224_v47, %v3240_v21  ;;  %v3258_v53 = vcombine.high %v3224_v47, %v3240_v21 }
 0x84e   :  { %v3173_v37 = vcombine.low %v3149_v22, %v3165_v27  ;;  %v3174_v38 = vcombine.high %v3149_v22, %v3165_v27  ;;  %v3189_v62 = vcombine.low %v3156_v8, %v3172_v46  ;;  %v3190_v26 = vcombine.high %v3156_v8, %v3172_v46 }
 0x84f   :  { %v3249_v28 = vrot.slane %v3241_v35, %v6152_v39  ;;  %v3256_v29 = vrot.slane %v3242_v34, %v6152_v39  ;;  %v3265_v63 = vrot.slane %v3257_v45, %v6152_v39  ;;  %v3272_v24 = vrot.slane %v3258_v53, %v6152_v39 }
 0x850   :  { %v3181_v2 = vrot.slane %v3173_v37, %v6152_v39  ;;  %v3188_v5 = vrot.slane %v3174_v38, %v6152_v39  ;;  %v3197_v1 = vrot.slane %v3189_v62, %v6152_v39  ;;  %v3204_v32 = vrot.slane %v3190_v26, %v6152_v39 }
 0x851   :  { %v3293_v60 = vcombine.low %v3249_v28, %v3265_v63  ;;  %v3301_v50 = vcombine.low %v3256_v29, %v3272_v24  ;;  %v5486_v61 = vcombine.high %v3249_v28, %v3265_v63  ;;  %v5487_v13 = vcombine.high %v3256_v29, %v3272_v24 }
 0x852   :  { %v3277_v14 = vcombine.low %v3181_v2, %v3197_v1  ;;  %v3285_v42 = vcombine.low %v3188_v5, %v3204_v32  ;;  %v5484_v56 = vcombine.high %v3181_v2, %v3197_v1  ;;  %v5485_v19 = vcombine.high %v3188_v5, %v3204_v32 }
 0x853   :  { %v3300_v31 = vrot.slane %v3293_v60, %v6130_v25  ;;  %v3308_v15 = vrot.slane %v3301_v50, %v6130_v25  ;;  %v3368_v11 = vrot.slane %v5486_v61, %v6130_v25  ;;  %v3376_v17 = vrot.slane %v5487_v13, %v6130_v25 }
 0x854   :  { %v3284_v9 = vrot.slane %v3277_v14, %v6130_v25  ;;  %v3292_v20 = vrot.slane %v3285_v42, %v6130_v25  ;;  %v3352_v23 = vrot.slane %v5484_v56, %v6130_v25  ;;  %v3360_v47 = vrot.slane %v5485_v19, %v6130_v25 }
 0x855   :  { %v3325_v18 = vcombine.low %v3300_v31, %v3308_v15  ;;  %v3326_v48 = vcombine.high %v3300_v31, %v3308_v15  ;;  %v3393_v46 = vcombine.low %v3368_v11, %v3376_v17  ;;  %v3394_v38 = vcombine.high %v3368_v11, %v3376_v17  ;;  %v6770_v15 = vpop.permute.xlu0 %3413  ;;  %v6772_v11 = vpop.permute.xlu1 %3415 }
 0x856   :  { %v3309_v21 = vcombine.low %v3284_v9, %v3292_v20  ;;  %v3310_v22 = vcombine.high %v3284_v9, %v3292_v20  ;;  %v3377_v35 = vcombine.low %v3352_v23, %v3360_v47  ;;  %v3378_v62 = vcombine.high %v3352_v23, %v3360_v47 }
 0x857   :  { %v3333_v8 = vrot.slane %v3325_v18, %v6152_v39  ;;  %v3340_v37 = vrot.slane %v3326_v48, %v6152_v39  ;;  %v3401_v63 = vrot.slane %v3393_v46, %v6152_v39  ;;  %v3408_v24 = vrot.slane %v3394_v38, %v6152_v39 }
 0x858   :  { %v3317_v27 = vrot.slane %v3309_v21, %v6152_v39  ;;  %v3324_v53 = vrot.slane %v3310_v22, %v6152_v39  ;;  %v3385_v29 = vrot.slane %v3377_v35, %v6152_v39  ;;  %v3392_v43 = vrot.slane %v3378_v62, %v6152_v39 }
 0x859   :  { %v6774_v9 = vpop.permute.xlu0 %3419  ;;  %v6776_v20 = vpop.permute.xlu1 %3417 }
 0x85a   :  { %v3341_v34 = vcombine.low %v3317_v27, %v3333_v8  ;;  %v3342_v45 = vcombine.high %v3317_v27, %v3333_v8  ;;  %v3343_v26 = vcombine.low %v3324_v53, %v3340_v37  ;;  %v3344_v28 = vcombine.high %v3324_v53, %v3340_v37 }
 0x85b   :  { %v3410_v3 = vcombine.high %v3385_v29, %v3401_v63 }
 0x85c   :  { %5720 = vmatpush3.xpose.msk.msra.mxu0 %vm1022_vm2, %v3341_v34  ;;  %5725 = vmatpush3.xpose.msk.msra.mxu1 %vm1022_vm2, %v3342_v45 }
 0x85d   :  { %5729 = vmatprep.subr.mxu0 %v6030_v16  ;;  %5734 = vmatprep.subr.mxu1 %v6030_v16 }
 0x85f   :  { %5722 = vmatmul.mubr.msk.f32.vlgmr.msra.gmra.mrb[16].mxu0 %vm1022_vm2, %v3045_v54  ;;  %5727 = vmatmul.mubr.msk.f32.vlgmr.msra.gmra.mrb[22].mxu1 %vm1022_vm2, %v3046_v36  ;;  %v3409_v54 = vcombine.low %v3385_v29, %v3401_v63  ;;  %v3411_v36 = vcombine.low %v3392_v43, %v3408_v24 }
 0x860   :  { %5730 = vmatpush3.xpose.msk.msra.mxu0 %vm1022_vm2, %v3343_v26  ;;  %5735 = vmatpush3.xpose.msk.msra.mxu1 %vm1022_vm2, %v3344_v28 }
 0x861   :  { %5731 = vmatprep.mubr.msk.f32.mxu0 %vm6031_vm1, %v6030_v16  ;;  %5736 = vmatprep.mubr.msk.f32.mxu1 %vm6031_vm1, %v6030_v16 }
 0x862   :  { %5739 = vmatprep.subr.mxu0 %v6030_v16  ;;  %5744 = vmatprep.subr.mxu1 %v6030_v16 }
 0x863   :  { %5732 = vmatmul.mubr.msk.f32.vlgmr.msra.gmra.mrb[18].mxu0 %vm1022_vm2, %v3047_v55  ;;  %5737 = vmatmul.mubr.msk.f32.vlgmr.msra.gmra.mrb[24].mxu1 %vm1022_vm2, %v3048_v58  ;;  %v3412_v55 = vcombine.high %v3392_v43, %v3408_v24 }
 0x864   :  { %5740 = vmatpush3.xpose.msk.msra.mxu0 %vm1022_vm2, %v3409_v54  ;;  %5745 = vmatpush3.xpose.msk.msra.mxu1 %vm1022_vm2, %v3410_v3 }
 0x865   :  { %5741 = vmatprep.mubr.msk.f32.mxu0 %vm6031_vm1, %v6030_v16  ;;  %5746 = vmatprep.mubr.msk.f32.mxu1 %vm6031_vm1, %v6030_v16 }
 0x866   :  { %5749 = vmatprep.subr.mxu0 %v6030_v16  ;;  %5754 = vmatprep.subr.mxu1 %v6030_v16 }
 0x867   :  { %5742 = vmatmul.mubr.msk.f32.vlgmr.msra.gmra.mrb[20].mxu0 %vm1022_vm2, %v3113_v4  ;;  %5747 = vmatmul.mubr.msk.f32.vlgmr.msra.gmra.mrb[26].mxu1 %vm1022_vm2, %v3114_v12 }
 0x868   :  { %5750 = vmatpush3.xpose.msk.msra.mxu0 %vm1022_vm2, %v3411_v36  ;;  %5755 = vmatpush3.xpose.msk.msra.mxu1 %vm1022_vm2, %v3412_v55 }
 0x869   :  { %5751 = vmatprep.mubr.msk.f32.mxu0 %vm6031_vm1, %v6030_v16  ;;  %5756 = vmatprep.mubr.msk.f32.mxu1 %vm6031_vm1, %v6030_v16 }
 0x86a   :  { %5759 = vmatprep.subr.mxu0 %v6030_v16  ;;  %5764 = vmatprep.subr.mxu1 %v6030_v16 }
 0x86b   :  { %5752 = vmatmul.mubr.msk.f32.vlgmr.msra.gmra.mrb[22].mxu0 %vm1022_vm2, %v3115_v57  ;;  %5757 = vmatmul.mubr.msk.f32.vlgmr.msra.gmra.mrb[28].mxu1 %vm1022_vm2, %v3116_v6 }
 0x86c   :  { %5761 = vmatprep.mubr.msk.f32.mxu0 %vm6031_vm1, %v6030_v16  ;;  %5766 = vmatprep.mubr.msk.f32.mxu1 %vm6031_vm1, %v6030_v16 }
 0x932   :  { %v3781_v41 = vpop.f32.mrb[16].mxu0  ;;  %v3857_v33 = vpop.f32.mrb[22].mxu1 }
 0x933   :  { %v5723_v52 = vpop.f32.mrb[17].mxu0  ;;  %v5728_v44 = vpop.f32.mrb[23].mxu1  ;;  %v4320_v58 = vsel %vm1022_vm2, %v3857_v33, -inf  ;;  %v4317_v4 = vsel %vm1022_vm2, %v3781_v41, -inf }
 0x934   :  { %4321 = vmax.xlane.f32.xlu0 %v4320_v58  ;;  %4318 = vmax.xlane.f32.xlu1 %v4317_v4 }
 0x936   :  { %v3933_v12 = vpop.f32.mrb[18].mxu0  ;;  %v4009_v10 = vpop.f32.mrb[24].mxu1 }
 0x937   :  { %v5733_v49 = vpop.f32.mrb[19].mxu0  ;;  %v5738_v57 = vpop.f32.mrb[25].mxu1  ;;  %v4326_v6 = vsel %vm1022_vm2, %v4009_v10, -inf  ;;  %v4323_v2 = vsel %vm1022_vm2, %v3933_v12, -inf }
 0x938   :  { %4327 = vmax.xlane.f32.xlu1 %v4326_v6  ;;  %4324 = vmax.xlane.f32.xlu0 %v4323_v2 }
 0x93a   :  { %v4085_v5 = vpop.f32.mrb[20].mxu0  ;;  %v4161_v1 = vpop.f32.mrb[26].mxu1 }
 0x93b   :  { %v5743_v32 = vpop.f32.mrb[21].mxu0  ;;  %v5748_v60 = vpop.f32.mrb[27].mxu1  ;;  %v4332_v50 = vsel %vm1022_vm2, %v4161_v1, -inf  ;;  %v4329_v61 = vsel %vm1022_vm2, %v4085_v5, -inf }
 0x93c   :  { %4333 = vmax.xlane.f32.xlu1 %v4332_v50  ;;  %4330 = vmax.xlane.f32.xlu0 %v4329_v61 }
 0x93e   :  { %v4237_v13 = vpop.f32.mrb[22].mxu0  ;;  %v4313_v14 = vpop.f32.mrb[28].mxu1 }
 0x93f   :  { %v5753_v42 = vpop.f32.mrb[23].mxu0  ;;  %v5758_v56 = vpop.f32.mrb[29].mxu1  ;;  %v4338_v19 = vsel %vm1022_vm2, %v4313_v14, -inf  ;;  %v4335_v31 = vsel %vm1022_vm2, %v4237_v13, -inf }
 0x940   :  { %4339 = vmax.xlane.f32.xlu1 %v4338_v19  ;;  %4336 = vmax.xlane.f32.xlu0 %v4335_v31 }
 0x951   :  { %3421 = vrot.lane.b32.xlu1 %v6574_v0, %s6029_s15 }
 0x956   :  { %3423 = vrot.lane.b32.xlu0 %v6570_v40, %s6029_s15 }
 0x9c1   :  { %v4322_v18 = vpop.xlane.xlu0 %4321  ;;  %v4319_v17 = vpop.xlane.xlu1 %4318 }
 0x9c2   :  { %v4342_v23 = vsub.f32 %v3857_v33, %v4322_v18  ;;  %v4341_v47 = vsub.f32 %v3781_v41, %v4319_v17 }
 0x9c4   :  { %v4351_v48 = vmul.f32 1.442695, %v4342_v23  ;;  %v4349_v21 = vmul.f32 1.442695, %v4341_v47 }
 0x9c5   :  { %v4325_v22 = vpop.xlane.xlu0 %4324  ;;  %v4328_v8 = vpop.xlane.xlu1 %4327 }
 0x9c6   :  { %5911 = vpow2.f32 %v4351_v48  ;;  %v4343_v0 = vsub.f32 %v3933_v12, %v4325_v22  ;;  %v4344_v27 = vsub.f32 %v4009_v10, %v4328_v8 }
 0x9c7   :  { %5913 = vpow2.f32 %v4349_v21 }
 0x9c8   :  { %v4353_v40 = vmul.f32 1.442695, %v4343_v0  ;;  %v4355_v46 = vmul.f32 1.442695, %v4344_v27 }
 0x9c9   :  { %v4331_v35 = vpop.xlane.xlu0 %4330  ;;  %v4334_v34 = vpop.xlane.xlu1 %4333 }
 0x9ca   :  { %5915 = vpow2.f32 %v4353_v40  ;;  %v4345_v45 = vsub.f32 %v4085_v5, %v4331_v35  ;;  %v4346_v53 = vsub.f32 %v4161_v1, %v4334_v34 }
 0x9cb   :  { %5917 = vpow2.f32 %v4355_v46 }
 0x9cc   :  { %v4357_v37 = vmul.f32 1.442695, %v4345_v45  ;;  %v4359_v38 = vmul.f32 1.442695, %v4346_v53 }
 0x9cd   :  { %v4337_v62 = vpop.xlane.xlu0 %4336  ;;  %v4340_v26 = vpop.xlane.xlu1 %4339 }
 0x9ce   :  { %5919 = vpow2.f32 %v4357_v37  ;;  %v4347_v28 = vsub.f32 %v4237_v13, %v4337_v62  ;;  %v4348_v29 = vsub.f32 %v4313_v14, %v4340_v26 }
 0x9cf   :  { %5921 = vpow2.f32 %v4359_v38 }
 0x9d0   :  { %v6778_v63 = vpop.eup %5911  ;;  %v4361_v24 = vmul.f32 1.442695, %v4347_v28  ;;  %v4363_v54 = vmul.f32 1.442695, %v4348_v29 }
 0x9d1   :  { %v6780_v3 = vpop.eup %5913  ;;  %v4368_v43 = vsel %vm1022_vm2, %v6778_v63, 0.0  ;;  %v3422_v2 = vpop.permute.xlu1 %3421 }
 0x9d2   :  { %5923 = vpow2.f32 %v4361_v24  ;;  %4369 = vadd.xlane.f32.xlu1 %v4368_v43  ;;  %v4365_v36 = vsel %vm1022_vm2, %v6780_v3, 0.0  ;;  %v3424_v5 = vpop.permute.xlu0 %3423  ;;  %v3437_v23 = vcombine.low %v6770_v15, %v3422_v2  ;;  %v3438_v27 = vcombine.high %v6770_v15, %v3422_v2 }
 0x9d3   :  { %5925 = vpow2.f32 %v4363_v54  ;;  %4366 = vadd.xlane.f32.xlu0 %v4365_v36  ;;  %v3506_v56 = vcombine.high %v6772_v11, %v3424_v5 }
 0x9d4   :  { %v6786_v55 = vpop.eup %5915  ;;  %v3445_v40 = vrot.slane %v3437_v23, %v6130_v25  ;;  %v3452_v28 = vrot.slane %v3438_v27, %v6130_v25 }
 0x9d5   :  { %v6788_v41 = vpop.eup %5917  ;;  %v4371_v33 = vsel %vm1022_vm2, %v6786_v55, 0.0  ;;  %v3520_v22 = vrot.slane %v3506_v56, %v6130_v25 }
 0x9d6   :  { %v4374_v52 = vsel %vm1022_vm2, %v6788_v41, 0.0 }
 0x9d7   :  { %4375 = vadd.xlane.f32.xlu1 %v4374_v52  ;;  %4372 = vadd.xlane.f32.xlu0 %v4371_v33 }
 0x9d8   :  { %v6794_v44 = vpop.eup %5919 }
 0x9d9   :  { %v6796_v58 = vpop.eup %5921  ;;  %v4377_v4 = vsel %vm1022_vm2, %v6794_v44, 0.0 }
 0x9da   :  { %v4380_v12 = vsel %vm1022_vm2, %v6796_v58, 0.0 }
 0x9db   :  { %4381 = vadd.xlane.f32.xlu1 %v4380_v12  ;;  %4378 = vadd.xlane.f32.xlu0 %v4377_v4 }
 0x9dc   :  { %v6802_v10 = vpop.eup %5923 }
 0x9dd   :  { %v6804_v49 = vpop.eup %5925  ;;  %v4383_v57 = vsel %vm1022_vm2, %v6802_v10, 0.0 }
 0x9de   :  { %v4386_v6 = vsel %vm1022_vm2, %v6804_v49, 0.0 }
 0x9df   :  { %4387 = vadd.xlane.f32.xlu1 %v4386_v6  ;;  %4384 = vadd.xlane.f32.xlu0 %v4383_v57 }
 0x9f0   :  { %3425 = vrot.lane.b32.xlu1 %v6588_v59, %s6029_s15  ;;  %v3505_v59 = vcombine.low %v6772_v11, %v3424_v5 }
 0x9f2   :  { %v3513_v47 = vrot.slane %v3505_v59, %v6130_v25 }
 0x9f5   :  { %3427 = vrot.lane.b32.xlu0 %v6582_v51, %s6029_s15 }
 0xa5f   :  { %v4370_v1 = vpop.xlane.xlu1 %4369 }
 0xa60   :  { %v4367_v32 = vpop.xlane.xlu0 %4366  ;;  %5927 = vrcp.f32 %v4370_v1 }
 0xa61   :  { %5929 = vrcp.f32 %v4367_v32 }
 0xa64   :  { %v6814_v60 = vpop.xlane.xlu1 %4375  ;;  %v6816_v50 = vpop.xlane.xlu0 %4372 }
 0xa65   :  { %5931 = vrcp.f32 %v6814_v60 }
 0xa66   :  { %5933 = vrcp.f32 %v6816_v50 }
 0xa68   :  { %v6818_v61 = vpop.xlane.xlu1 %4381  ;;  %v6820_v13 = vpop.xlane.xlu0 %4378 }
 0xa69   :  { %5935 = vrcp.f32 %v6818_v61 }
 0xa6a   :  { %v5928_v53 = vpop.eup %5927  ;;  %5937 = vrcp.f32 %v6820_v13 }
 0xa6b   :  { %v5930_v26 = vpop.eup %5929  ;;  %v4398_v54 = vmul.f32 %v5928_v53, %v4370_v1 }
 0xa6c   :  { %v6822_v14 = vpop.xlane.xlu1 %4387  ;;  %v6824_v42 = vpop.xlane.xlu0 %4384  ;;  %v4397_v43 = vmul.f32 %v5930_v26, %v4367_v32 }
 0xa6d   :  { %5939 = vrcp.f32 %v6822_v14  ;;  %v4406_v1 = vsub.f32 2.0, %v4398_v54 }
 0xa6e   :  { %5941 = vrcp.f32 %v6824_v42  ;;  %v4405_v56 = vsub.f32 2.0, %v4397_v43 }
 0xa6f   :  { %v5932_v6 = vpop.eup %5931 }
 0xa70   :  { %v3426_v51 = vpop.permute.xlu1 %3425  ;;  %v3428_v19 = vpop.permute.xlu0 %3427 }
 0xa71   :  { %v3453_v31 = vcombine.low %v6776_v20, %v3426_v51  ;;  %v3521_v18 = vcombine.low %v6774_v9, %v3428_v19  ;;  %v3522_v17 = vcombine.high %v6774_v9, %v3428_v19  ;;  %v3454_v11 = vcombine.high %v6776_v20, %v3426_v51  ;;  %v5934_v5 = vpop.eup %5933 }
 0xa73   :  { %v3529_v48 = vrot.slane %v3521_v18, %v6130_v25  ;;  %v3536_v21 = vrot.slane %v3522_v17, %v6130_v25  ;;  %v3461_v8 = vrot.slane %v3453_v31, %v6130_v25  ;;  %v3468_v38 = vrot.slane %v3454_v11, %v6130_v25 }
 0xa74   :  { %v4400_v18 = vmul.f32 %v5932_v6, %v6814_v60  ;;  %v4414_v11 = vmul.f32 %v5928_v53, %v4406_v1 }
 0xa75   :  { %v3537_v0 = vcombine.low %v3513_v47, %v3529_v48  ;;  %v3538_v9 = vcombine.high %v3513_v47, %v3529_v48  ;;  %v3553_v46 = vcombine.low %v3520_v22, %v3536_v21  ;;  %v3554_v35 = vcombine.high %v3520_v22, %v3536_v21  ;;  %v5936_v22 = vpop.eup %5935 }
 0xa76   :  { %v3469_v62 = vcombine.low %v3445_v40, %v3461_v8  ;;  %v3470_v15 = vcombine.high %v3445_v40, %v3461_v8  ;;  %v3485_v33 = vcombine.low %v3452_v28, %v3468_v38  ;;  %v3486_v57 = vcombine.high %v3452_v28, %v3468_v38  ;;  %v5938_v27 = vpop.eup %5937 }
 0xa77   :  { %v3545_v34 = vrot.slane %v3537_v0, %v6152_v39  ;;  %v3552_v45 = vrot.slane %v3538_v9, %v6152_v39  ;;  %v3561_v37 = vrot.slane %v3553_v46, %v6152_v39  ;;  %v3568_v20 = vrot.slane %v3554_v35, %v6152_v39 }
 0xa78   :  { %v3477_v36 = vrot.slane %v3469_v62, %v6152_v39  ;;  %v3484_v12 = vrot.slane %v3470_v15, %v6152_v39  ;;  %v3493_v2 = vrot.slane %v3485_v33, %v6152_v39  ;;  %v3500_v32 = vrot.slane %v3486_v57, %v6152_v39 }
 0xa79   :  { %v3589_v29 = vcombine.low %v3545_v34, %v3561_v37  ;;  %v3597_v24 = vcombine.low %v3552_v45, %v3568_v20  ;;  %v5490_v59 = vcombine.high %v3545_v34, %v3561_v37  ;;  %v5491_v51 = vcombine.high %v3552_v45, %v3568_v20  ;;  %v5940_v34 = vpop.eup %5939 }
 0xa7a   :  { %v3573_v19 = vcombine.low %v3477_v36, %v3493_v2  ;;  %v5488_v31 = vcombine.high %v3477_v36, %v3493_v2  ;;  %v3581_v17 = vcombine.low %v3484_v12, %v3500_v32  ;;  %v5489_v23 = vcombine.high %v3484_v12, %v3500_v32  ;;  %v5942_v53 = vpop.eup %5941 }
 0xa7b   :  { %v3596_v52 = vrot.slane %v3589_v29, %v6130_v25  ;;  %v3604_v4 = vrot.slane %v3597_v24, %v6130_v25  ;;  %v4399_v48 = vmul.f32 %v5934_v5, %v6816_v50  ;;  %v3664_v8 = vrot.slane %v5490_v59, %v6130_v25 }
 0xa7c   :  { %v3580_v21 = vrot.slane %v3573_v19, %v6130_v25  ;;  %v3672_v0 = vrot.slane %v5491_v51, %v6130_v25  ;;  %v3588_v9 = vrot.slane %v3581_v17, %v6130_v25  ;;  %v4413_v40 = vmul.f32 %v5930_v26, %v4405_v56 }
 0xa7d   :  { %v3621_v47 = vcombine.low %v3596_v52, %v3604_v4  ;;  %v3648_v46 = vrot.slane %v5488_v31, %v6130_v25  ;;  %v3656_v60 = vrot.slane %v5489_v23, %v6130_v25  ;;  %v3622_v35 = vcombine.high %v3596_v52, %v3604_v4 }
 0xa7e   :  { %v4408_v45 = vsub.f32 2.0, %v4400_v18  ;;  %v3605_v50 = vcombine.low %v3580_v21, %v3588_v9  ;;  %v3606_v20 = vcombine.high %v3580_v21, %v3588_v9  ;;  %v4407_v38 = vsub.f32 2.0, %v4399_v48 }
 0xa7f   :  { %v3629_v37 = vrot.slane %v3621_v47, %v6152_v39  ;;  %v4402_v62 = vmul.f32 %v5936_v22, %v6818_v61  ;;  %v4401_v15 = vmul.f32 %v5938_v27, %v6820_v13  ;;  %v3689_v26 = vcombine.low %v3664_v8, %v3672_v0 }
 0xa80   :  { %v3613_v28 = vrot.slane %v3605_v50, %v6152_v39  ;;  %v4422_v29 = vmul.f32 %v6778_v63, %v4414_v11  ;;  %v3620_v24 = vrot.slane %v3606_v20, %v6152_v39  ;;  %v3636_v54 = vrot.slane %v3622_v35, %v6152_v39  ;;  %v5944_v11 = vld [vmem:[#allocation5 + $0x20] sm:$0xff] }
 0xa81   :  { %v3673_v43 = vcombine.low %v3648_v46, %v3656_v60  ;;  %v4421_v36 = vmul.f32 %v6780_v3, %v4413_v40  ;;  %v4416_v33 = vmul.f32 %v5932_v6, %v4408_v45  ;;  %v4415_v12 = vmul.f32 %v5934_v5, %v4407_v38 }
 0xa82   :  { %v3637_v52 = vcombine.low %v3613_v28, %v3629_v37  ;;  %v3638_v4 = vcombine.high %v3613_v28, %v3629_v37  ;;  %v4410_v57 = vsub.f32 2.0, %v4402_v62  ;;  %v4403_v61 = vmul.f32 %v5942_v53, %v6824_v42 }
 0xa83   :  { %v4404_v13 = vmul.f32 %v5940_v34, %v6822_v14  ;;  %v4409_v2 = vsub.f32 2.0, %v4401_v15  ;;  %v3697_v63 = vrot.slane %v3689_v26, %v6152_v39  ;;  %v3674_v1 = vcombine.high %v3648_v46, %v3656_v60 }
 0xa84   :  { %5760 = vmatpush3.msra.mxu0 %v3637_v52  ;;  %5765 = vmatpush3.msra.mxu1 %v3638_v4  ;;  %v3690_v59 = vcombine.high %v3664_v8, %v3672_v0  ;;  %v3639_v3 = vcombine.low %v3620_v24, %v3636_v54  ;;  %v3640_v6 = vcombine.high %v3620_v24, %v3636_v54  ;;  %v4411_v56 = vsub.f32 2.0, %v4403_v61  ;;  %v5945_v8 = vld [vmem:[#allocation5 + $0x28] sm:$0xff] }
 0xa85   :  { %5762 = vmatmul.mubr.msk.f32.vlgmr.msra.gmra.mrb[24].mxu0 %vm1022_vm2, %v4421_v36  ;;  %5767 = vmatmul.mubr.msk.f32.vlgmr.msra.gmra.mrb[30].mxu1 %vm1022_vm2, %v4422_v29  ;;  %v3681_v5 = vrot.slane %v3673_v43, %v6152_v39  ;;  %v4423_v14 = vmul.f32 %v6786_v55, %v4415_v12  ;;  %v4424_v42 = vmul.f32 %v6788_v41, %v4416_v33  ;;  %v4412_v19 = vsub.f32 2.0, %v4404_v13 }
 0xa86   :  { %5769 = vmatprep.subr.mxu0 %v6030_v16  ;;  %5774 = vmatprep.subr.mxu1 %v6030_v16  ;;  %v4418_v51 = vmul.f32 %v5936_v22, %v4410_v57  ;;  %v4417_v32 = vmul.f32 %v5938_v27, %v4409_v2  ;;  %v3704_v31 = vrot.slane %v3690_v59, %v6152_v39 }
 0xa87   :  { %5770 = vmatpush3.msra.mxu0 %v3639_v3  ;;  %5775 = vmatpush3.msra.mxu1 %v3640_v6  ;;  %v3705_v55 = vcombine.low %v3681_v5, %v3697_v63  ;;  %v3706_v41 = vcombine.high %v3681_v5, %v3697_v63  ;;  %v3688_v18 = vrot.slane %v3674_v1, %v6152_v39 }
 0xa88   :  { %5771 = vmatprep.mubr.msk.f32.mxu0 %vm6031_vm1, %v6030_v16  ;;  %5776 = vmatprep.mubr.msk.f32.mxu1 %vm6031_vm1, %v6030_v16  ;;  %v4426_v17 = vmul.f32 %v6796_v58, %v4418_v51  ;;  %v4425_v23 = vmul.f32 %v6794_v44, %v4417_v32  ;;  %v4419_v47 = vmul.f32 %v5942_v53, %v4411_v56 }
 0xa89   :  { %5779 = vmatprep.subr.mxu0 %v6030_v16  ;;  %5784 = vmatprep.subr.mxu1 %v6030_v16  ;;  %v4420_v48 = vmul.f32 %v5940_v34, %v4412_v19  ;;  %v3707_v21 = vcombine.low %v3688_v18, %v3704_v31  ;;  %v3708_v22 = vcombine.high %v3688_v18, %v3704_v31 }
 0xa8a   :  { %5772 = vmatmul.mubr.msk.f32.vlgmr.msra.gmra.mrb[26].mxu0 %vm1022_vm2, %v4423_v14  ;;  %5777 = vmatmul.mubr.msk.f32.vlgmr.msra.gmra.mrb[32].mxu1 %vm1022_vm2, %v4424_v42  ;;  %v4427_v44 = vmul.f32 %v6802_v10, %v4419_v47  ;;  %v5869_v0 = vpack.i.bf16 %v5945_v8, %v5944_v11  ;;  %v5874_v9 = vpack.i.bf16 %v6548_v7, %v6546_v30 }
 0xa8b   :  { %5780 = vmatpush3.msra.mxu0 %v3705_v55  ;;  %5785 = vmatpush3.msra.mxu1 %v3706_v41  ;;  %v4428_v58 = vmul.f32 %v6804_v49, %v4420_v48 }
 0xa8c   :  { %5781 = vmatprep.mubr.msk.f32.mxu0 %vm6031_vm1, %v6030_v16  ;;  %5786 = vmatprep.mubr.msk.f32.mxu1 %vm6031_vm1, %v6030_v16 }
 0xa8d   :  { %5789 = vmatprep.subr.mxu0 %v6030_v16  ;;  %5794 = vmatprep.subr.mxu1 %v6030_v16 }
 0xa8e   :  { %5782 = vmatmul.mubr.msk.f32.vlgmr.msra.gmra.mrb[28].mxu0 %vm1022_vm2, %v4425_v23  ;;  %5787 = vmatmul.mubr.msk.f32.vlgmr.msra.gmra.mrb[34].mxu1 %vm1022_vm2, %v4426_v17 }
 0xa8f   :  { %5790 = vmatpush3.msra.mxu0 %v3707_v21  ;;  %5795 = vmatpush3.msra.mxu1 %v3708_v22 }
 0xa90   :  { %5791 = vmatprep.mubr.msk.f32.mxu0 %vm6031_vm1, %v6030_v16  ;;  %5796 = vmatprep.mubr.msk.f32.mxu1 %vm6031_vm1, %v6030_v16 }
 0xa91   :  { %5870 = vrot.lane.b32.xlu1 %v5869_v0, %s6032_s16  ;;  %5875 = vrot.lane.b32.xlu0 %v5874_v9, %s6032_s16 }
 0xa92   :  { %5792 = vmatmul.mubr.msk.f32.vlgmr.msra.gmra.mrb[30].mxu0 %vm1022_vm2, %v4427_v44  ;;  %5797 = vmatmul.mubr.msk.f32.vlgmr.msra.gmra.mrb[36].mxu1 %vm1022_vm2, %v4428_v58 }
 0xb03   :  { %v5871_v36 = vpop.permute.xlu1 %5870  ;;  %v5876_v33 = vpop.permute.xlu0 %5875 }
 0xb04   :  { %v5873_v5 = vunpack.i.h.bf16 %v5871_v36  ;;  %v5872_v14 = vunpack.i.l.bf16 %v5871_v36  ;;  %v5878_v42 = vunpack.i.h.bf16 %v5876_v33  ;;  %v5877_v51 = vunpack.i.l.bf16 %v5876_v33 }
 0xb06   :  { %v5834_v22 = vpack.c.bf16 %v5873_v5, %v5872_v14  ;;  %v5838_v44 = vpack.c.bf16 %v5878_v42, %v5877_v51 }
 0xb08   :  { %5835 = vmatprep.subr.bf16.mxu0 %v5834_v22 }
 0xb09   :  { %5837 = vmatpush3.bf16.msra.mxu0 %v5834_v22 }
 0xb0a   :  { %5839 = vmatprep.subr.bf16.mxu0 %v5838_v44 }
 0xb0d   :  { %5841 = vmatpush3.bf16.msra.mxu0 %v5838_v44 }
 0xb58   :  { %v4498_v10 = vpop.f32.mrb[24].mxu0  ;;  %v4571_v49 = vpop.f32.mrb[30].mxu1 }
 0xb59   :  { %v5763_v27 = vpop.f32.mrb[25].mxu0  ;;  %v5768_v40 = vpop.f32.mrb[31].mxu1 }
 0xb5d   :  { %v4644_v46 = vpop.f32.mrb[26].mxu0  ;;  %v4717_v60 = vpop.f32.mrb[32].mxu1 }
 0xb5e   :  { %v5013_v35 = vcombine.low %v4498_v10, %v4644_v46  ;;  %v5014_v34 = vcombine.high %v4498_v10, %v4644_v46  ;;  %v5029_v45 = vcombine.low %v4571_v49, %v4717_v60  ;;  %v5030_v50 = vcombine.high %v4571_v49, %v4717_v60  ;;  %v5773_v37 = vpop.f32.mrb[27].mxu0  ;;  %v5778_v20 = vpop.f32.mrb[33].mxu1 }
 0xb60   :  { %v5021_v53 = vrot.slane %v5013_v35, %v6130_v25  ;;  %v5028_v30 = vrot.slane %v5014_v34, %v6130_v25  ;;  %v5037_v7 = vrot.slane %v5029_v45, %v6130_v25  ;;  %v5044_v38 = vrot.slane %v5030_v50, %v6130_v25 }
 0xb61   :  { %v4790_v62 = vpop.f32.mrb[28].mxu0  ;;  %v4863_v15 = vpop.f32.mrb[34].mxu1 }
 0xb62   :  { %v5045_v28 = vcombine.low %v5021_v53, %v5037_v7  ;;  %v5046_v26 = vcombine.high %v5021_v53, %v5037_v7  ;;  %v5061_v29 = vcombine.low %v5028_v30, %v5044_v38  ;;  %v5062_v24 = vcombine.high %v5028_v30, %v5044_v38  ;;  %v5783_v54 = vpop.f32.mrb[29].mxu0  ;;  %v5788_v43 = vpop.f32.mrb[35].mxu1 }
 0xb64   :  { %v5053_v12 = vrot.slane %v5045_v28, %v6152_v39  ;;  %v5060_v57 = vrot.slane %v5046_v26, %v6152_v39  ;;  %v5069_v61 = vrot.slane %v5061_v29, %v6152_v39  ;;  %v5076_v13 = vrot.slane %v5062_v24, %v6152_v39 }
 0xb65   :  { %v4936_v52 = vpop.f32.mrb[30].mxu0  ;;  %v5009_v4 = vpop.f32.mrb[36].mxu1 }
 0xb66   :  { %v5793_v2 = vpop.f32.mrb[31].mxu0  ;;  %v5798_v63 = vpop.f32.mrb[37].mxu1  ;;  %v5081_v1 = vcombine.low %v4790_v62, %v4936_v52  ;;  %v5082_v59 = vcombine.high %v4790_v62, %v4936_v52  ;;  %v5097_v3 = vcombine.low %v4863_v15, %v5009_v4  ;;  %v5098_v6 = vcombine.high %v4863_v15, %v5009_v4 }
 0xb67   :  { %v5077_v55 = vcombine.high %v5053_v12, %v6030_v16  ;;  %v5078_v41 = vcombine.high %v5060_v57, %v6030_v16  ;;  %v5079_v18 = vcombine.high %v5069_v61, %v6030_v16  ;;  %v5080_v17 = vcombine.high %v5076_v13, %v6030_v16 }
 0xb68   :  { %v5089_v32 = vrot.slane %v5081_v1, %v6130_v25  ;;  %v5096_v56 = vrot.slane %v5082_v59, %v6130_v25  ;;  %v5105_v19 = vrot.slane %v5097_v3, %v6130_v25  ;;  %v5112_v31 = vrot.slane %v5098_v6, %v6130_v25 }
 0xb69   :  { %v5217_v9 = vcombine.low %v5069_v61, %v5079_v18  ;;  %v5233_v10 = vcombine.low %v5076_v13, %v5080_v17  ;;  %v5149_v49 = vcombine.low %v5053_v12, %v5077_v55  ;;  %v5165_v27 = vcombine.low %v5060_v57, %v5078_v41 }
 0xb6a   :  { %v5113_v23 = vcombine.low %v5089_v32, %v5105_v19  ;;  %v5114_v47 = vcombine.high %v5089_v32, %v5105_v19  ;;  %v5129_v48 = vcombine.low %v5096_v56, %v5112_v31  ;;  %v5130_v21 = vcombine.high %v5096_v56, %v5112_v31 }
 0xb6b   :  { %v5224_v20 = vrot.slane %v5217_v9, %v6130_v25  ;;  %v5240_v53 = vrot.slane %v5233_v10, %v6130_v25  ;;  %v5156_v30 = vrot.slane %v5149_v49, %v6130_v25  ;;  %v5172_v7 = vrot.slane %v5165_v27, %v6130_v25 }
 0xb6c   :  { %v5121_v58 = vrot.slane %v5113_v23, %v6152_v39  ;;  %v5128_v11 = vrot.slane %v5114_v47, %v6152_v39  ;;  %v5137_v8 = vrot.slane %v5129_v48, %v6152_v39  ;;  %v5144_v0 = vrot.slane %v5130_v21, %v6152_v39 }
 0xb6e   :  { %v5145_v40 = vcombine.high %v5121_v58, %v6030_v16  ;;  %v5146_v46 = vcombine.high %v5128_v11, %v6030_v16  ;;  %v5147_v60 = vcombine.high %v5137_v8, %v6030_v16  ;;  %v5148_v35 = vcombine.high %v5144_v0, %v6030_v16 }
 0xb70   :  { %v5225_v34 = vcombine.low %v5137_v8, %v5147_v60  ;;  %v5241_v45 = vcombine.low %v5144_v0, %v5148_v35  ;;  %v5157_v50 = vcombine.low %v5121_v58, %v5145_v40  ;;  %v5173_v37 = vcombine.low %v5128_v11, %v5146_v46 }
 0xb72   :  { %v5232_v38 = vrot.slane %v5225_v34, %v6130_v25  ;;  %v5248_v62 = vrot.slane %v5241_v45, %v6130_v25  ;;  %v5164_v16 = vrot.slane %v5157_v50, %v6130_v25  ;;  %v5180_v15 = vrot.slane %v5173_v37, %v6130_v25 }
 0xb74   :  { %v5249_v28 = vcombine.low %v5224_v20, %v5232_v38  ;;  %v5265_v26 = vcombine.low %v5240_v53, %v5248_v62  ;;  %v5181_v29 = vcombine.low %v5156_v30, %v5164_v16  ;;  %v5197_v24 = vcombine.low %v5172_v7, %v5180_v15 }
 0xb75   :  { %v5250_v54 = vcombine.high %v5224_v20, %v5232_v38  ;;  %v5266_v43 = vcombine.high %v5240_v53, %v5248_v62  ;;  %v5182_v36 = vcombine.high %v5156_v30, %v5164_v16  ;;  %v5198_v33 = vcombine.high %v5172_v7, %v5180_v15 }
 0xb76   :  { %v5257_v52 = vrot.slane %v5249_v28, %v6152_v39  ;;  %v5273_v4 = vrot.slane %v5265_v26, %v6152_v39  ;;  %v5189_v12 = vrot.slane %v5181_v29, %v6152_v39  ;;  %v5205_v57 = vrot.slane %v5197_v24, %v6152_v39 }
 0xb77   :  { %v5264_v61 = vrot.slane %v5250_v54, %v6152_v39  ;;  %v5280_v25 = vrot.slane %v5266_v43, %v6152_v39  ;;  %v5196_v13 = vrot.slane %v5182_v36, %v6152_v39  ;;  %v5212_v2 = vrot.slane %v5198_v33, %v6152_v39  ;;  %v5946_v39 = vld [vmem:[%s6993_s2 + $0x1] ss:$0 sm:$0xff]  ;;  %s6035_s2 = smov [#allocation7]  }
 0xb78   :  { %v5282_v63 = vcombine.high %v5257_v52, %v5273_v4  ;;  %v5281_v1 = vcombine.low %v5257_v52, %v5273_v4  ;;  %v5214_v59 = vcombine.high %v5189_v12, %v5205_v57  ;;  %v5213_v3 = vcombine.low %v5189_v12, %v5205_v57  ;;  %s5422_s27 = sshll.u32 %s6035_s2, 4  ;;  %s5423_s27 = int_to_ptr.vmem [resolvable:$true] %s5422_s27 }
 0xb79   :  { %v5283_v6 = vcombine.low %v5264_v61, %v5280_v25  ;;  %v5215_v5 = vcombine.low %v5196_v13, %v5212_v2  ;;  %v5284_v14 = vcombine.high %v5264_v61, %v5280_v25  ;;  %v5216_v42 = vcombine.high %v5196_v13, %v5212_v2  ;;  %s5991_s28 = scalar_lea.vmem %s5423_s27, 256  ;;  %p5996_p3 = scmp.lt.s32.totalorder %s5423_s27, %s5423_s27 }
 0xb7a   :  { %5289 = vrot.lane.b32.xlu0 %v5282_v63, %s6021_s23  ;;  %5287 = vrot.lane.b32.xlu1 %v5214_v59, %s6021_s23  ;;  %p5992_p2 = scmp.ne.s32.totalorder %s5423_s27, %s5991_s28  ;;  %p5997_p4 = scmp.lt.s32.totalorder %s5991_s28, %s5991_s28 }
 0xb7c   :  { %p5998_p5 = por %p5997_p4, %p5996_p3 }
 0xb7e   :  { %5297 = vrot.lane.b32.xlu0 %v5283_v6, %s6033_s17  ;;  %5295 = vrot.lane.b32.xlu1 %v5215_v5, %s6033_s17  ;;  %p5999_p6 = pnand %p5998_p5, %p5992_p2 }
 0xb82   :  { %5305 = vrot.lane.b32.xlu0 %v5284_v14, %s6034_s18  ;;  %5303 = vrot.lane.b32.xlu1 %v5216_v42, %s6034_s18 }
 0xb86   :  { %5331 = vrot.lane.b32.xlu1 %v5946_v39, %s6032_s16 }
 0xbec   :  { %v5290_v51 = vpop.permute.xlu0 %5289  ;;  %v5288_v32 = vpop.permute.xlu1 %5287 }
 0xbed   :  { %v5310_v31 = vsel %vm1022_vm2, %v5281_v1, %v5290_v51  ;;  %v5309_v55 = vsel %vm1022_vm2, %v5213_v3, %v5288_v32 }
 0xbf0   :  { %v5298_v56 = vpop.permute.xlu0 %5297  ;;  %v5296_v19 = vpop.permute.xlu1 %5295 }
 0xbf1   :  { %v5312_v41 = vsel %vm2625_vm3, %v5310_v31, %v5298_v56  ;;  %v5311_v18 = vsel %vm2625_vm3, %v5309_v55, %v5296_v19 }
 0xbf4   :  { %v5306_v17 = vpop.permute.xlu0 %5305  ;;  %v5304_v23 = vpop.permute.xlu1 %5303 }
 0xbf5   :  { %v5314_v47 = vsel %vm2628_vm4, %v5312_v41, %v5306_v17  ;;  %v5313_v48 = vsel %vm2628_vm4, %v5311_v18, %v5304_v23 }
 0xbf6   :  { %5807 = vmatprep.mubr.msk.f32.mxu0 %vm56_vm0, %v5313_v48 }
 0xbf7   :  { %5808 = vmatmul.mubr.msk.f32.vlgmr.msra.gmra.mrb[32].mxu0 %vm56_vm0, %v5314_v47 }
 0xbf8   :  { %v5332_v21 = vpop.permute.xlu1 %5331 }
 0xcca   :  { %v5809_v22 = vpop.f32.mrb[32].mxu0 }
 0xccb   :  { %v5412_v44 = vadd.f32 %v5809_v22, %v5332_v21  ;;  %v5406_v58 = vpop.f32.mrb[33].mxu0 }
 0xccc   :  { %v5407_v11 = vadd.f32 %v5406_v58, %v5332_v21 }
 0xccd   :  { %5416 = vst.msk [vmem:[#allocation7 + $0x8] sm:$0xff] %vm56_vm0, %v5412_v44 }
 0xcce   :  { %5415 = vst.msk [vmem:[#allocation7] sm:$0xff] %vm56_vm0, %v5407_v11 }
 0xccf   :  { %6002 = shalt.err (!%p5999_p6)
}
 0xcd0   :  { %s6003_s4 = scalar_lea.hbm %s6994_s3, 256 }
 0xcd1   :  { %p6004_p7 = scmp.ne.s32.totalorder %s6994_s3, %s6003_s4  ;;  %p6007_p8 = scmp.lt.u32.totalorder %s6003_s4, %s6994_s3 }
 0xcd3   :  { %p6009_p9 = pnand %p6007_p8, %p6004_p7 }
 0xcd5   :  { %6012 = shalt.err (!%p6009_p9)
}
 0xcd6   :  { %5428 = dma.vmem_to_hbm [thread:$0]  %s5423_s27, 256, %s6994_s3, [#allocation4], %s6020_s22, %s6020_s22, %s6021_s23  }
 0xcd7   :  { %6017 = dma.done.wait [#allocation4], 256  }
 0xcd8   :  { %6018 = vsyncadd [#allocation4], 4294967040 }
 0xcd9   :  { %5432 = vsyncpa [#allocation3], 1 }
 0xcda   :  { %5433 = vsyncpa [#allocation6], 1 }
 0xcdb   :  { %5434 = vsyncpa [#allocation4], 1 }

</bundles_post_ra>
